<compile_context>
chip_gen: v6e
topology: v6e:2x2x1
jax: 0.10.0
libtpu: 0.0.40
codegen_flags: <defaults>
</compile_context>

<pallas_src>
import functools

import jax
import jax.numpy as jnp
from jax.experimental import pallas as pl
from jax.experimental.pallas import tpu as pltpu


def _round_up(x, m):
    return ((x + m - 1) // m) * m


def _swish(x):
    return x * jax.nn.sigmoid(x)


def _softplus(x):
    # numerically stable softplus: max(x,0) + log1p(exp(-|x|))
    return jnp.maximum(x, 0.0) + jnp.log1p(jnp.exp(-jnp.abs(x)))


def _ensemble_mlp_kernel(
    x_ref,
    w1_ref, b1_ref,
    w2_ref, b2_ref,
    w3_ref, b3_ref,
    w4_ref, b4_ref,
    w5_ref, b5_ref,
    maxlv_ref, minlv_ref,
    mean_ref, var_ref,
    *, ret_log_var: bool, compute_dtype, od_pad: int,
):
    in_dim = x_ref.shape[-1]
    in_pad = w1_ref.shape[1]
    od = maxlv_ref.shape[-1]
    tn = x_ref.shape[1]

    def fc(h, w_ref, b_ref):
        # bf16 x bf16 -> f32 MXU accumulation + f32 bias broadcast over rows
        return (jnp.dot(h, w_ref[0], preferred_element_type=jnp.float32)
                + b_ref[0])

    # Stream x at its true feature width; cast + zero-pad to a lane-dense
    # (tn, in_pad) tile inside the kernel.  Padded w1 rows are zero, so the
    # pad contributes nothing to the contraction.
    x = x_ref[0].astype(compute_dtype)                          # (tn, in_dim)
    if in_pad != in_dim:
        x = jnp.concatenate(
            [x, jnp.zeros((tn, in_pad - in_dim), dtype=x.dtype)], axis=-1)

    h = _swish(fc(x, w1_ref, b1_ref)).astype(compute_dtype)
    h = _swish(fc(h, w2_ref, b2_ref)).astype(compute_dtype)
    h = _swish(fc(h, w3_ref, b3_ref)).astype(compute_dtype)
    h = _swish(fc(h, w4_ref, b4_ref)).astype(compute_dtype)

    # Single fused final matmul: mean columns live at lanes [0:od], logvar
    # columns at lanes [od_pad:od_pad+od]  ->  128-aligned, tile-clean slices.
    z = fc(h, w5_ref, b5_ref)                                   # (tn, 2*od_pad) f32
    mean = z[:, :od]
    logvar = z[:, od_pad:od_pad + od]

    max_lv = maxlv_ref[...]                                     # (1, od) f32
    min_lv = minlv_ref[...]
    logvar = max_lv - _softplus(max_lv - logvar)
    logvar = min_lv + _softplus(logvar - min_lv)

    mean_ref[0] = mean.astype(mean_ref.dtype)
    if ret_log_var:
        var_ref[0] = logvar.astype(var_ref.dtype)
    else:
        var_ref[0] = jnp.exp(logvar).astype(var_ref.dtype)


def ensemble_model_forward(x, params, max_logvar, min_logvar,
                           ret_log_var=False, tile_n=1024,
                           compute_dtype=jnp.bfloat16,
                           out_dtype=jnp.float32):
    """params: list of 5 (weight, bias) pairs for nn1..nn5 (EnsembleFC layout).

    x: (E, N, state+action) float32.  Returns (mean, var-or-logvar) of shape
    (E, N, output_dim) in `out_dtype` (use bf16 to halve output HBM traffic).
    """
    E, N, in_dim = x.shape
    od = max_logvar.shape[-1]
    hidden = params[0][0].shape[-1]

    # ---- TPU-friendly padded dims (weights only; x / outputs stay unpadded) --
    in_pad = _round_up(in_dim, 128)
    hid_pad = _round_up(hidden, 128)
    od_pad = _round_up(od, 128)

    # N tile: multiple of 16 (bf16 sublane packing); partial last tile allowed.
    tn = max(16, min(_round_up(tile_n, 16), _round_up(N, 16)))
    n_tiles = pl.cdiv(N, tn)
    # TODO(synk): for the tiny-N regime (n_tiles == 1) a 2-member e-axis block
    # would halve per-step overhead; not implemented to keep odd-E handling simple.

    # ---- pad / cast weights (small, one-time) --------------------------------
    def pad_wb(w, b, fin_p, fout_p):
        fin, fout = w.shape[1], w.shape[2]
        wp = jnp.pad(w, ((0, 0), (0, fin_p - fin), (0, fout_p - fout))
                     ).astype(compute_dtype)
        bp = jnp.pad(b, ((0, 0), (0, 0), (0, fout_p - fout))).astype(jnp.float32)
        return wp, bp

    (w1, b1), (w2, b2), (w3, b3), (w4, b4), (w5, b5) = params
    w1p, b1p = pad_wb(w1, b1, in_pad, hid_pad)
    w2p, b2p = pad_wb(w2, b2, hid_pad, hid_pad)
    w3p, b3p = pad_wb(w3, b3, hid_pad, hid_pad)
    w4p, b4p = pad_wb(w4, b4, hid_pad, hid_pad)

    # Fused final layer: mean cols at [0:od], logvar cols at [od_pad:od_pad+od].
    w5f = jnp.zeros((E, hid_pad, 2 * od_pad), compute_dtype)
    w5f = w5f.at[:, :hidden, :od].set(w5[:, :, :od].astype(compute_dtype))
    w5f = w5f.at[:, :hidden, od_pad:od_pad + od].set(
        w5[:, :, od:].astype(compute_dtype))
    b5f = jnp.zeros((E, 1, 2 * od_pad), jnp.float32)
    b5f = b5f.at[:, :, :od].set(b5[:, :, :od].astype(jnp.float32))
    b5f = b5f.at[:, :, od_pad:od_pad + od].set(b5[:, :, od:].astype(jnp.float32))

    maxlv = max_logvar.astype(jnp.float32)
    minlv = min_logvar.astype(jnp.float32)

    # ---- specs ---------------------------------------------------------------
    def ens_spec(shape3):
        # per-ensemble block, constant across the inner N-tile axis (resident)
        return pl.BlockSpec(shape3, lambda e, n: (e, 0, 0))

    in_specs = [
        pl.BlockSpec((1, tn, in_dim), lambda e, n: (e, n, 0)),       # x tile (raw)
        ens_spec((1, in_pad, hid_pad)), ens_spec((1, 1, hid_pad)),   # nn1
        ens_spec((1, hid_pad, hid_pad)), ens_spec((1, 1, hid_pad)),  # nn2
        ens_spec((1, hid_pad, hid_pad)), ens_spec((1, 1, hid_pad)),  # nn3
        ens_spec((1, hid_pad, hid_pad)), ens_spec((1, 1, hid_pad)),  # nn4
        ens_spec((1, hid_pad, 2 * od_pad)), ens_spec((1, 1, 2 * od_pad)),  # nn5 fused
        pl.BlockSpec((1, od), lambda e, n: (0, 0)),                  # max_logvar
        pl.BlockSpec((1, od), lambda e, n: (0, 0)),                  # min_logvar
    ]
    out_specs = (
        pl.BlockSpec((1, tn, od), lambda e, n: (e, n, 0)),
        pl.BlockSpec((1, tn, od), lambda e, n: (e, n, 0)),
    )
    out_shape = (
        jax.ShapeDtypeStruct((E, N, od), out_dtype),
        jax.ShapeDtypeStruct((E, N, od), out_dtype),
    )

    kernel = functools.partial(_ensemble_mlp_kernel, ret_log_var=ret_log_var,
                               compute_dtype=compute_dtype, od_pad=od_pad)
    mean, var = pl.pallas_call(
        kernel,
        out_shape=out_shape,
        grid=(E, n_tiles),
        in_specs=in_specs,
        out_specs=out_specs,
        compiler_params=pltpu.CompilerParams(
            # Shard the (large) N-tile axis across TensorCores on v7x; the odd
            # ensemble axis stays sequential -> balanced load, tiny weight cost.
            dimension_semantics=("arbitrary", "parallel"),
            vmem_limit_bytes=32 * 1024 * 1024,
        ),
    )(x, w1p, b1p, w2p, b2p, w3p, b3p, w4p, b4p, w5f, b5f, maxlv, minlv)

    return mean, var


def init_ensemble_params(key, state_size, action_size, reward_size,
                         ensemble_size, hidden_size):
    """Deterministic truncated-normal init matching init_weights() (f32 params)."""
    output_dim = state_size + reward_size
    layer_dims = [
        (state_size + action_size, hidden_size),
        (hidden_size, hidden_size),
        (hidden_size, hidden_size),
        (hidden_size, hidden_size),
        (hidden_size, output_dim * 2),
    ]
    params = []
    for (fin, fout) in layer_dims:
        key, wk = jax.random.split(key)
        std = 1.0 / (2.0 * jnp.sqrt(float(fin)))
        w = std * jax.random.truncated_normal(
            wk, -2.0, 2.0, (ensemble_size, fin, fout), dtype=jnp.float32)
        b = jnp.zeros((ensemble_size, 1, fout), dtype=jnp.float32)
        params.append((w, b))
    max_logvar = jnp.full((1, output_dim), 0.5, dtype=jnp.float32)
    min_logvar = jnp.full((1, output_dim), -10.0, dtype=jnp.float32)
    return params, max_logvar, min_logvar


def _ref_forward(x, params, max_lv, min_lv, ret_log_var=False,
                 compute_dtype=jnp.bfloat16):
    """Pure-JAX reference with the same bf16-operand / f32-accumulation numerics."""
    h = x.astype(compute_dtype)
    out = None
    for i, (w, b) in enumerate(params):
        z = jnp.einsum("eni,eio->eno", h, w.astype(compute_dtype),
                       preferred_element_type=jnp.float32) + b
        if i < 4:
            h = (z * jax.nn.sigmoid(z)).astype(compute_dtype)
        else:
            out = z
    od = max_lv.shape[-1]
    mean = out[..., :od]
    logvar = out[..., od:]
    logvar = max_lv - jax.nn.softplus(max_lv - logvar)
    logvar = min_lv + jax.nn.softplus(logvar - min_lv)
    if ret_log_var:
        return mean, logvar
    return mean, jnp.exp(logvar)


if __name__ == "__main__":
    # Small synthetic config consistent with EnsembleModel.__init__
    state_size = 8
    action_size = 4
    reward_size = 1
    ensemble_size = 4
    hidden_size = 32
    N = 8  # per-ensemble batch

    key = jax.random.PRNGKey(0)
    pkey, xkey = jax.random.split(key)

    params, max_logvar, min_logvar = init_ensemble_params(
        pkey, state_size, action_size, reward_size, ensemble_size, hidden_size)

    x = jax.random.normal(
        xkey, (ensemble_size, N, state_size + action_size), dtype=jnp.float32)

    # ret_log_var=False path
    mean, var = ensemble_model_forward(
        x, params, max_logvar, min_logvar, ret_log_var=False)
    jax.block_until_ready((mean, var))
    ref_mean, ref_var = _ref_forward(x, params, max_logvar, min_logvar,
                                     ret_log_var=False)
    assert mean.shape == ref_mean.shape and var.shape == ref_var.shape
    assert jnp.allclose(mean, ref_mean, atol=1e-3, rtol=1e-3)
    assert jnp.allclose(var, ref_var, atol=1e-3, rtol=1e-3)

    # ret_log_var=True path
    mean2, logvar2 = ensemble_model_forward(
        x, params, max_logvar, min_logvar, ret_log_var=True)
    jax.block_until_ready((mean2, logvar2))
    ref_mean2, ref_logvar2 = _ref_forward(x, params, max_logvar, min_logvar,
                                          ret_log_var=True)
    assert jnp.allclose(mean2, ref_mean2, atol=1e-3, rtol=1e-3)
    assert jnp.allclose(logvar2, ref_logvar2, atol=1e-3, rtol=1e-3)

    print("KERNEL_OK")
</pallas_src>

<mosaic_0001>
module attributes {stable_mosaic.version = 11 : i64} {
  func.func @_ensemble_mlp_kernel(%arg0: i32, %arg1: i32, %arg2: memref<1x16x12xf32, #tpu.memory_space<vmem>>, %arg3: memref<1x128x128xbf16, #tpu.memory_space<vmem>>, %arg4: memref<1x1x128xf32, #tpu.memory_space<vmem>>, %arg5: memref<1x128x128xbf16, #tpu.memory_space<vmem>>, %arg6: memref<1x1x128xf32, #tpu.memory_space<vmem>>, %arg7: memref<1x128x128xbf16, #tpu.memory_space<vmem>>, %arg8: memref<1x1x128xf32, #tpu.memory_space<vmem>>, %arg9: memref<1x128x128xbf16, #tpu.memory_space<vmem>>, %arg10: memref<1x1x128xf32, #tpu.memory_space<vmem>>, %arg11: memref<1x128x256xbf16, #tpu.memory_space<vmem>>, %arg12: memref<1x1x256xf32, #tpu.memory_space<vmem>>, %arg13: memref<1x9xf32, #tpu.memory_space<vmem>>, %arg14: memref<1x9xf32, #tpu.memory_space<vmem>>, %arg15: memref<1x16x9xf32, #tpu.memory_space<vmem>>, %arg16: memref<1x16x9xf32, #tpu.memory_space<vmem>>) attributes {dimension_semantics = [#tpu.dimension_semantics<arbitrary>, #tpu.dimension_semantics<parallel>], iteration_bounds = array<i64: 4, 1>, scalar_prefetch = 0 : i64, scratch_operands = 0 : i64, tpu.core_type = #tpu.core_type<tc>, window_params = [{transform_indices = @transform_0, window_bounds = array<i64: 1, 16, 12>}, {transform_indices = @transform_1, window_bounds = array<i64: 1, 128, 128>}, {transform_indices = @transform_2, window_bounds = array<i64: 1, 1, 128>}, {transform_indices = @transform_3, window_bounds = array<i64: 1, 128, 128>}, {transform_indices = @transform_4, window_bounds = array<i64: 1, 1, 128>}, {transform_indices = @transform_5, window_bounds = array<i64: 1, 128, 128>}, {transform_indices = @transform_6, window_bounds = array<i64: 1, 1, 128>}, {transform_indices = @transform_7, window_bounds = array<i64: 1, 128, 128>}, {transform_indices = @transform_8, window_bounds = array<i64: 1, 1, 128>}, {transform_indices = @transform_9, window_bounds = array<i64: 1, 128, 256>}, {transform_indices = @transform_10, window_bounds = array<i64: 1, 1, 256>}, {pipeline_mode = #tpu.pipeline_mode<synchronous>, transform_indices = @transform_11, window_bounds = array<i64: 1, 9>}, {pipeline_mode = #tpu.pipeline_mode<synchronous>, transform_indices = @transform_12, window_bounds = array<i64: 1, 9>}, {transform_indices = @transform_13, window_bounds = array<i64: 1, 16, 9>}, {transform_indices = @transform_14, window_bounds = array<i64: 1, 16, 9>}]} {
    %c0 = arith.constant 0 : index
    %c0_0 = arith.constant 0 : index
    %c0_1 = arith.constant 0 : index
    %0 = vector.load %arg2[%c0, %c0_0, %c0_1] : memref<1x16x12xf32, #tpu.memory_space<vmem>>, vector<1x16x12xf32>
    %1 = vector.shape_cast %0 : vector<1x16x12xf32> to vector<16x12xf32>
    %2 = arith.truncf %1 : vector<16x12xf32> to vector<16x12xbf16>
    %cst = arith.constant 0.000000e+00 : bf16
    %3 = vector.broadcast %cst : bf16 to vector<16x116xbf16>
    %4 = tpu.concatenate %2, %3 in 1 : vector<16x12xbf16>, vector<16x116xbf16> -> vector<16x128xbf16>
    %c0_2 = arith.constant 0 : index
    %c0_3 = arith.constant 0 : index
    %c0_4 = arith.constant 0 : index
    %5 = vector.load %arg3[%c0_2, %c0_3, %c0_4] : memref<1x128x128xbf16, #tpu.memory_space<vmem>>, vector<1x128x128xbf16>
    %6 = vector.shape_cast %5 : vector<1x128x128xbf16> to vector<128x128xbf16>
    %cst_5 = arith.constant dense<0.000000e+00> : vector<16x128xf32>
    %7 = tpu.matmul %4, %6, %cst_5 {dimension_numbers = #tpu.dot_dimension_numbers<[1], [0], [0], [1], [0, 0, 1, 1], [], []>} : vector<16x128xbf16>, vector<128x128xbf16>, vector<16x128xf32> -> vector<16x128xf32>
    %c0_6 = arith.constant 0 : index
    %c0_7 = arith.constant 0 : index
    %c0_8 = arith.constant 0 : index
    %8 = vector.load %arg4[%c0_6, %c0_7, %c0_8] : memref<1x1x128xf32, #tpu.memory_space<vmem>>, vector<1x1x128xf32>
    %9 = vector.shape_cast %8 : vector<1x1x128xf32> to vector<1x128xf32>
    %10 = vector.broadcast %9 : vector<1x128xf32> to vector<16x128xf32>
    %11 = arith.addf %7, %10 : vector<16x128xf32>
    %12 = arith.negf %11 : vector<16x128xf32>
    %13 = math.exp %12 : vector<16x128xf32>
    %cst_9 = arith.constant 1.000000e+00 : f32
    %14 = vector.broadcast %cst_9 : f32 to vector<16x128xf32>
    %15 = arith.addf %14, %13 : vector<16x128xf32>
    %16 = arith.divf %14, %15 : vector<16x128xf32>
    %17 = arith.mulf %11, %16 : vector<16x128xf32>
    %18 = arith.truncf %17 : vector<16x128xf32> to vector<16x128xbf16>
    %c0_10 = arith.constant 0 : index
    %c0_11 = arith.constant 0 : index
    %c0_12 = arith.constant 0 : index
    %19 = vector.load %arg5[%c0_10, %c0_11, %c0_12] : memref<1x128x128xbf16, #tpu.memory_space<vmem>>, vector<1x128x128xbf16>
    %20 = vector.shape_cast %19 : vector<1x128x128xbf16> to vector<128x128xbf16>
    %cst_13 = arith.constant dense<0.000000e+00> : vector<16x128xf32>
    %21 = tpu.matmul %18, %20, %cst_13 {dimension_numbers = #tpu.dot_dimension_numbers<[1], [0], [0], [1], [0, 0, 1, 1], [], []>} : vector<16x128xbf16>, vector<128x128xbf16>, vector<16x128xf32> -> vector<16x128xf32>
    %c0_14 = arith.constant 0 : index
    %c0_15 = arith.constant 0 : index
    %c0_16 = arith.constant 0 : index
    %22 = vector.load %arg6[%c0_14, %c0_15, %c0_16] : memref<1x1x128xf32, #tpu.memory_space<vmem>>, vector<1x1x128xf32>
    %23 = vector.shape_cast %22 : vector<1x1x128xf32> to vector<1x128xf32>
    %24 = vector.broadcast %23 : vector<1x128xf32> to vector<16x128xf32>
    %25 = arith.addf %21, %24 : vector<16x128xf32>
    %26 = arith.negf %25 : vector<16x128xf32>
    %27 = math.exp %26 : vector<16x128xf32>
    %cst_17 = arith.constant 1.000000e+00 : f32
    %28 = vector.broadcast %cst_17 : f32 to vector<16x128xf32>
    %29 = arith.addf %28, %27 : vector<16x128xf32>
    %30 = arith.divf %28, %29 : vector<16x128xf32>
    %31 = arith.mulf %25, %30 : vector<16x128xf32>
    %32 = arith.truncf %31 : vector<16x128xf32> to vector<16x128xbf16>
    %c0_18 = arith.constant 0 : index
    %c0_19 = arith.constant 0 : index
    %c0_20 = arith.constant 0 : index
    %33 = vector.load %arg7[%c0_18, %c0_19, %c0_20] : memref<1x128x128xbf16, #tpu.memory_space<vmem>>, vector<1x128x128xbf16>
    %34 = vector.shape_cast %33 : vector<1x128x128xbf16> to vector<128x128xbf16>
    %cst_21 = arith.constant dense<0.000000e+00> : vector<16x128xf32>
    %35 = tpu.matmul %32, %34, %cst_21 {dimension_numbers = #tpu.dot_dimension_numbers<[1], [0], [0], [1], [0, 0, 1, 1], [], []>} : vector<16x128xbf16>, vector<128x128xbf16>, vector<16x128xf32> -> vector<16x128xf32>
    %c0_22 = arith.constant 0 : index
    %c0_23 = arith.constant 0 : index
    %c0_24 = arith.constant 0 : index
    %36 = vector.load %arg8[%c0_22, %c0_23, %c0_24] : memref<1x1x128xf32, #tpu.memory_space<vmem>>, vector<1x1x128xf32>
    %37 = vector.shape_cast %36 : vector<1x1x128xf32> to vector<1x128xf32>
    %38 = vector.broadcast %37 : vector<1x128xf32> to vector<16x128xf32>
    %39 = arith.addf %35, %38 : vector<16x128xf32>
    %40 = arith.negf %39 : vector<16x128xf32>
    %41 = math.exp %40 : vector<16x128xf32>
    %cst_25 = arith.constant 1.000000e+00 : f32
    %42 = vector.broadcast %cst_25 : f32 to vector<16x128xf32>
    %43 = arith.addf %42, %41 : vector<16x128xf32>
    %44 = arith.divf %42, %43 : vector<16x128xf32>
    %45 = arith.mulf %39, %44 : vector<16x128xf32>
    %46 = arith.truncf %45 : vector<16x128xf32> to vector<16x128xbf16>
    %c0_26 = arith.constant 0 : index
    %c0_27 = arith.constant 0 : index
    %c0_28 = arith.constant 0 : index
    %47 = vector.load %arg9[%c0_26, %c0_27, %c0_28] : memref<1x128x128xbf16, #tpu.memory_space<vmem>>, vector<1x128x128xbf16>
    %48 = vector.shape_cast %47 : vector<1x128x128xbf16> to vector<128x128xbf16>
    %cst_29 = arith.constant dense<0.000000e+00> : vector<16x128xf32>
    %49 = tpu.matmul %46, %48, %cst_29 {dimension_numbers = #tpu.dot_dimension_numbers<[1], [0], [0], [1], [0, 0, 1, 1], [], []>} : vector<16x128xbf16>, vector<128x128xbf16>, vector<16x128xf32> -> vector<16x128xf32>
    %c0_30 = arith.constant 0 : index
    %c0_31 = arith.constant 0 : index
    %c0_32 = arith.constant 0 : index
    %50 = vector.load %arg10[%c0_30, %c0_31, %c0_32] : memref<1x1x128xf32, #tpu.memory_space<vmem>>, vector<1x1x128xf32>
    %51 = vector.shape_cast %50 : vector<1x1x128xf32> to vector<1x128xf32>
    %52 = vector.broadcast %51 : vector<1x128xf32> to vector<16x128xf32>
    %53 = arith.addf %49, %52 : vector<16x128xf32>
    %54 = arith.negf %53 : vector<16x128xf32>
    %55 = math.exp %54 : vector<16x128xf32>
    %cst_33 = arith.constant 1.000000e+00 : f32
    %56 = vector.broadcast %cst_33 : f32 to vector<16x128xf32>
    %57 = arith.addf %56, %55 : vector<16x128xf32>
    %58 = arith.divf %56, %57 : vector<16x128xf32>
    %59 = arith.mulf %53, %58 : vector<16x128xf32>
    %60 = arith.truncf %59 : vector<16x128xf32> to vector<16x128xbf16>
    %c0_34 = arith.constant 0 : index
    %c0_35 = arith.constant 0 : index
    %c0_36 = arith.constant 0 : index
    %61 = vector.load %arg11[%c0_34, %c0_35, %c0_36] : memref<1x128x256xbf16, #tpu.memory_space<vmem>>, vector<1x128x256xbf16>
    %62 = vector.shape_cast %61 : vector<1x128x256xbf16> to vector<128x256xbf16>
    %cst_37 = arith.constant dense<0.000000e+00> : vector<16x256xf32>
    %63 = tpu.matmul %60, %62, %cst_37 {dimension_numbers = #tpu.dot_dimension_numbers<[1], [0], [0], [1], [0, 0, 1, 1], [], []>} : vector<16x128xbf16>, vector<128x256xbf16>, vector<16x256xf32> -> vector<16x256xf32>
    %c0_38 = arith.constant 0 : index
    %c0_39 = arith.constant 0 : index
    %c0_40 = arith.constant 0 : index
    %64 = vector.load %arg12[%c0_38, %c0_39, %c0_40] : memref<1x1x256xf32, #tpu.memory_space<vmem>>, vector<1x1x256xf32>
    %65 = vector.shape_cast %64 : vector<1x1x256xf32> to vector<1x256xf32>
    %66 = vector.broadcast %65 : vector<1x256xf32> to vector<16x256xf32>
    %67 = arith.addf %63, %66 : vector<16x256xf32>
    %68 = vector.extract_strided_slice %67 {offsets = [0, 0], sizes = [16, 9], strides = [1, 1]} : vector<16x256xf32> to vector<16x9xf32>
    %69 = vector.extract_strided_slice %67 {offsets = [0, 128], sizes = [16, 9], strides = [1, 1]} : vector<16x256xf32> to vector<16x9xf32>
    %c0_41 = arith.constant 0 : index
    %c0_42 = arith.constant 0 : index
    %70 = vector.load %arg13[%c0_41, %c0_42] : memref<1x9xf32, #tpu.memory_space<vmem>>, vector<1x9xf32>
    %c0_43 = arith.constant 0 : index
    %c0_44 = arith.constant 0 : index
    %71 = vector.load %arg14[%c0_43, %c0_44] : memref<1x9xf32, #tpu.memory_space<vmem>>, vector<1x9xf32>
    %72 = vector.broadcast %70 : vector<1x9xf32> to vector<16x9xf32>
    %73 = arith.subf %72, %69 : vector<16x9xf32>
    %cst_45 = arith.constant 0.000000e+00 : f32
    %74 = vector.broadcast %cst_45 : f32 to vector<16x9xf32>
    %75 = arith.maximumf %73, %74 : vector<16x9xf32>
    %76 = math.absf %73 : vector<16x9xf32>
    %cst_46 = arith.constant 0.000000e+00 : f32
    %77 = vector.broadcast %cst_46 : f32 to vector<16x9xf32>
    %78 = arith.subf %77, %76 : vector<16x9xf32>
    %79 = math.exp %78 : vector<16x9xf32>
    %80 = math.log1p %79 : vector<16x9xf32>
    %81 = arith.addf %75, %80 : vector<16x9xf32>
    %82 = vector.broadcast %70 : vector<1x9xf32> to vector<16x9xf32>
    %83 = arith.subf %82, %81 : vector<16x9xf32>
    %84 = vector.broadcast %71 : vector<1x9xf32> to vector<16x9xf32>
    %85 = arith.subf %83, %84 : vector<16x9xf32>
    %cst_47 = arith.constant 0.000000e+00 : f32
    %86 = vector.broadcast %cst_47 : f32 to vector<16x9xf32>
    %87 = arith.maximumf %85, %86 : vector<16x9xf32>
    %88 = math.absf %85 : vector<16x9xf32>
    %cst_48 = arith.constant 0.000000e+00 : f32
    %89 = vector.broadcast %cst_48 : f32 to vector<16x9xf32>
    %90 = arith.subf %89, %88 : vector<16x9xf32>
    %91 = math.exp %90 : vector<16x9xf32>
    %92 = math.log1p %91 : vector<16x9xf32>
    %93 = arith.addf %87, %92 : vector<16x9xf32>
    %94 = vector.broadcast %71 : vector<1x9xf32> to vector<16x9xf32>
    %95 = arith.addf %94, %93 : vector<16x9xf32>
    %c0_49 = arith.constant 0 : index
    %c0_50 = arith.constant 0 : index
    %c0_51 = arith.constant 0 : index
    %96 = vector.load %arg15[%c0_49, %c0_50, %c0_51] : memref<1x16x9xf32, #tpu.memory_space<vmem>>, vector<1x16x9xf32>
    %97 = vector.shape_cast %96 : vector<1x16x9xf32> to vector<16x9xf32>
    %98 = vector.shape_cast %68 : vector<16x9xf32> to vector<1x16x9xf32>
    tpu.vector_store %arg15[%c0_49, %c0_50, %c0_51], %98 {strides = array<i32>} : memref<1x16x9xf32, #tpu.memory_space<vmem>>, vector<1x16x9xf32>,
    %99 = math.exp %95 : vector<16x9xf32>
    %c0_52 = arith.constant 0 : index
    %c0_53 = arith.constant 0 : index
    %c0_54 = arith.constant 0 : index
    %100 = vector.load %arg16[%c0_52, %c0_53, %c0_54] : memref<1x16x9xf32, #tpu.memory_space<vmem>>, vector<1x16x9xf32>
    %101 = vector.shape_cast %100 : vector<1x16x9xf32> to vector<16x9xf32>
    %102 = vector.shape_cast %99 : vector<16x9xf32> to vector<1x16x9xf32>
    tpu.vector_store %arg16[%c0_52, %c0_53, %c0_54], %102 {strides = array<i32>} : memref<1x16x9xf32, #tpu.memory_space<vmem>>, vector<1x16x9xf32>,
    return
  }
  func.func @transform_0(%arg0: i32, %arg1: i32) -> (i32, i32, i32) {
    %c0_i32 = arith.constant 0 : i32
    %c0_i32_0 = arith.constant 0 : i32
    return %arg0, %arg1, %c0_i32 : i32, i32, i32
  }
  func.func @transform_1(%arg0: i32, %arg1: i32) -> (i32, i32, i32) {
    %c0_i32 = arith.constant 0 : i32
    %c0_i32_0 = arith.constant 0 : i32
    %c0_i32_1 = arith.constant 0 : i32
    return %arg0, %c0_i32, %c0_i32_0 : i32, i32, i32
  }
  func.func @transform_2(%arg0: i32, %arg1: i32) -> (i32, i32, i32) {
    %c0_i32 = arith.constant 0 : i32
    %c0_i32_0 = arith.constant 0 : i32
    %c0_i32_1 = arith.constant 0 : i32
    return %arg0, %c0_i32, %c0_i32_0 : i32, i32, i32
  }
  func.func @transform_3(%arg0: i32, %arg1: i32) -> (i32, i32, i32) {
    %c0_i32 = arith.constant 0 : i32
    %c0_i32_0 = arith.constant 0 : i32
    %c0_i32_1 = arith.constant 0 : i32
    return %arg0, %c0_i32, %c0_i32_0 : i32, i32, i32
  }
  func.func @transform_4(%arg0: i32, %arg1: i32) -> (i32, i32, i32) {
    %c0_i32 = arith.constant 0 : i32
    %c0_i32_0 = arith.constant 0 : i32
    %c0_i32_1 = arith.constant 0 : i32
    return %arg0, %c0_i32, %c0_i32_0 : i32, i32, i32
  }
  func.func @transform_5(%arg0: i32, %arg1: i32) -> (i32, i32, i32) {
    %c0_i32 = arith.constant 0 : i32
    %c0_i32_0 = arith.constant 0 : i32
    %c0_i32_1 = arith.constant 0 : i32
    return %arg0, %c0_i32, %c0_i32_0 : i32, i32, i32
  }
  func.func @transform_6(%arg0: i32, %arg1: i32) -> (i32, i32, i32) {
    %c0_i32 = arith.constant 0 : i32
    %c0_i32_0 = arith.constant 0 : i32
    %c0_i32_1 = arith.constant 0 : i32
    return %arg0, %c0_i32, %c0_i32_0 : i32, i32, i32
  }
  func.func @transform_7(%arg0: i32, %arg1: i32) -> (i32, i32, i32) {
    %c0_i32 = arith.constant 0 : i32
    %c0_i32_0 = arith.constant 0 : i32
    %c0_i32_1 = arith.constant 0 : i32
    return %arg0, %c0_i32, %c0_i32_0 : i32, i32, i32
  }
  func.func @transform_8(%arg0: i32, %arg1: i32) -> (i32, i32, i32) {
    %c0_i32 = arith.constant 0 : i32
    %c0_i32_0 = arith.constant 0 : i32
    %c0_i32_1 = arith.constant 0 : i32
    return %arg0, %c0_i32, %c0_i32_0 : i32, i32, i32
  }
  func.func @transform_9(%arg0: i32, %arg1: i32) -> (i32, i32, i32) {
    %c0_i32 = arith.constant 0 : i32
    %c0_i32_0 = arith.constant 0 : i32
    %c0_i32_1 = arith.constant 0 : i32
    return %arg0, %c0_i32, %c0_i32_0 : i32, i32, i32
  }
  func.func @transform_10(%arg0: i32, %arg1: i32) -> (i32, i32, i32) {
    %c0_i32 = arith.constant 0 : i32
    %c0_i32_0 = arith.constant 0 : i32
    %c0_i32_1 = arith.constant 0 : i32
    return %arg0, %c0_i32, %c0_i32_0 : i32, i32, i32
  }
  func.func @transform_11(%arg0: i32, %arg1: i32) -> (i32, i32) {
    %c0_i32 = arith.constant 0 : i32
    %c0_i32_0 = arith.constant 0 : i32
    %c0_i32_1 = arith.constant 0 : i32
    return %c0_i32, %c0_i32_0 : i32, i32
  }
  func.func @transform_12(%arg0: i32, %arg1: i32) -> (i32, i32) {
    %c0_i32 = arith.constant 0 : i32
    %c0_i32_0 = arith.constant 0 : i32
    %c0_i32_1 = arith.constant 0 : i32
    return %c0_i32, %c0_i32_0 : i32, i32
  }
  func.func @transform_13(%arg0: i32, %arg1: i32) -> (i32, i32, i32) {
    %c0_i32 = arith.constant 0 : i32
    %c0_i32_0 = arith.constant 0 : i32
    return %arg0, %arg1, %c0_i32 : i32, i32, i32
  }
  func.func @transform_14(%arg0: i32, %arg1: i32) -> (i32, i32, i32) {
    %c0_i32 = arith.constant 0 : i32
    %c0_i32_0 = arith.constant 0 : i32
    return %arg0, %arg1, %c0_i32 : i32, i32, i32
  }
}

</mosaic_0001>

<bundles_post_ra>
// kernel: tpu_custom_call.1
= control target key start
LH: loop header
LB: loop body
LE: loop exit
PB: predicated region body
PF: predicated region fallthrough
CT: control target
= control target key end

     0   :  { %s3186_s0 = inlined_call_operand.hbm [shape: f32[4,8,12], index: 0, kind: input, shape index: {}]   ;;  %s3187_s1 = inlined_call_operand.hbm [shape: bf16[4,128,128], index: 1, kind: input, shape index: {}]   ;;  %s3188_s2 = inlined_call_operand.hbm [shape: f32[4,1,128], index: 2, kind: input, shape index: {}]   ;;  %s3189_s3 = inlined_call_operand.hbm [shape: bf16[4,128,128], index: 3, kind: input, shape index: {}]   ;;  %s3190_s4 = inlined_call_operand.vmem [shape: f32[4,1,128], index: 4, kind: input, shape index: {}]   ;;  %s3191_s5 = inlined_call_operand.hbm [shape: bf16[4,128,128], index: 5, kind: input, shape index: {}]   ;;  %s3192_s6 = inlined_call_operand.vmem [shape: f32[4,1,128], index: 6, kind: input, shape index: {}]   ;;  %s3193_s7 = inlined_call_operand.hbm [shape: bf16[4,128,128], index: 7, kind: input, shape index: {}]   ;;  %s3194_s8 = inlined_call_operand.hbm [shape: f32[4,1,128], index: 8, kind: input, shape index: {}]   ;;  %s3195_s9 = inlined_call_operand.hbm [shape: bf16[4,128,256], index: 9, kind: input, shape index: {}]   ;;  %s3196_s10 = inlined_call_operand.vmem [shape: f32[4,1,256], index: 10, kind: input, shape index: {}]   ;;  %s3197_s11 = inlined_call_operand.vmem [shape: f32[1,9], index: 11, kind: input, shape index: {}]   ;;  %s3198_s12 = inlined_call_operand.vmem [shape: f32[1,9], index: 12, kind: input, shape index: {}]   ;;  %s3199_s13 = inlined_call_operand.hbm [shape: f32[4,8,9], index: 13, kind: output, shape index: {0}]   ;;  %s3200_s14 = inlined_call_operand.hbm [shape: f32[4,8,9], index: 14, kind: output, shape index: {1}]  }
   0x1   :  { %3214 = sst [smem:[#allocation33_spill]] %s3186_s0 }
   0x2   :  { %3215 = sst [smem:[#allocation34_spill]] %s3187_s1 }
   0x3   :  { %3216 = sst [smem:[#allocation35_spill]] %s3190_s4 }
   0x4   :  { %3217 = sst [smem:[#allocation36_spill]] %s3192_s6 }
   0x5   :  { %3218 = sst [smem:[#allocation37_spill]] %s3196_s10 }
   0x6   :  { %3219 = sst [smem:[#allocation38_spill]] %s3197_s11 }
   0x7   :  { %3220 = sst [smem:[#allocation39_spill]] %s3198_s12 }
   0x8   :  { %3221 = sst [smem:[#allocation40_spill]] %s3199_s13 }
   0x9   :  { %3222 = sst [smem:[#allocation41_spill]] %s3200_s14 }
   0xa   :  { %20 = vsyncpa [#allocation3], 0 }
   0xb   :  { %22 = vsyncpa [#allocation3 + $0x1], 0 }
   0xc   :  { %23 = vsyncpa [#allocation6], 0 }
   0xd   :  { %25 = vsyncpa [#allocation6 + $0x1], 0 }
   0xe   :  { %26 = vsyncpa [#allocation9], 0 }
   0xf   :  { %28 = vsyncpa [#allocation9 + $0x1], 0 }
  0x10   :  { %29 = vsyncpa [#allocation12], 0 }
  0x11   :  { %31 = vsyncpa [#allocation12 + $0x1], 0 }
  0x12   :  { %32 = vsyncpa [#allocation15], 0 }
  0x13   :  { %34 = vsyncpa [#allocation15 + $0x1], 0 }
  0x14   :  { %35 = vsyncpa [#allocation4], 0 }
  0x15   :  { %37 = vsyncpa [#allocation4 + $0x1], 0 }
  0x16   :  { %38 = vsyncpa [#allocation18], 0 }
  0x17   :  { %40 = vsyncpa [#allocation18 + $0x1], 0  ;;  %s2771_s29 = smov 0   ;;  %s2773_s30 = smov 0  }
  0x18   :  { %s2775_s15 = smov 0   ;;  %s2777_s16 = smov 0  }
  0x19   :  { %s2779_s17 = smov 0   ;;  %s2781_s18 = smov 0  }
  0x1a LB: > { %3223 = sst [smem:[#allocation26_spill]] %s2651_s29  ;;  %s2802_s19 = sadd.s32 4294967295, %s2671_s18   ;;  %s2671_s18 = sphi %s2781_s18, %s46_s18   ;;  %s2667_s17 = sphi %s2779_s17, %s3262_s17   ;;  %s2663_s16 = sphi %s2777_s16, %s3261_s16   ;;  %s2659_s15 = sphi %s2775_s15, %s3257_s15   ;;  %s2655_s30 = sphi %s2773_s30, %s3260_s30   ;;  %s2651_s29 = sphi %s2771_s29, %s3259_s29  }
  0x1b   : > { %3224 = sst [smem:[#allocation27_spill]] %s2659_s15  ;;  %s1933_s20 = sadd.s32 4294967294, %s2671_s18  }
  0x1c   : > { %3225 = sst [smem:[#allocation28_spill]] %s2663_s16  ;;  %s58_s21 = sadd.s32 1, %s2667_s17 }
  0x1d   : > { %s67_s22 = sadd.s32 1, %s2659_s15  ;;  %p60_p0 = scmp.ge.s32.totalorder %s58_s21, 4 }
  0x1e   : > { %p74_p1 = scmp.ne.s32.totalorder %s2659_s15, %s2655_s30  ;;  %p75_p2 = scmp.eq.s32.totalorder %s2671_s18, 0 }
  0x1f   : > { %p80_p3 = scmp.ne.s32.totalorder %s2655_s30, %s2651_s29  ;;  %s3264_s21 = smov (%p60_p0, %s58_s21), 0 }
  0x20   : > { %3226 = sst [smem:[#allocation29_spill]] %s3264_s21  ;;  %p2814_p4 = por %p75_p2, %p74_p1 }
  0x21   : > { %p81_p5 = scmp.eq.s32.totalorder %s2802_s19, 0  ;;  %s62_s24 = ssub.s32 %s2667_s17, %s3264_s21 }
  0x22   : > { %p408_p6 = scmp.eq.s32.totalorder %s2802_s19, 3  ;;  %p65_p7 = scmp.eq.s32.totalorder %s62_s24, 0 }
  0x23   : > { %p2822_p8 = por %p81_p5, %p80_p3  ;;  %p414_p10 = scmp.eq.s32.totalorder %s1933_s20, 3 }
  0x24   : > { %p2826_p9 = por %p408_p6, %p74_p1  ;;  %p1935_p12 = scmp.ge.s32.totalorder %s2671_s18, 4 }
  0x25   : > { %s2831_s27 = scalar_select %p65_p7, %s2659_s15, %s67_s22  }
  0x26   : > { %s3229_s26 = scalar_select %p2826_p9, 1, 0 }
  0x27   : > { %3231 = sst [smem:[#allocation31_spill]] %s2831_s27  ;;  %p2833_p11 = por %p414_p10, %p80_p3 }
  0x28   : > { %3230 = sst [smem:[#allocation30_spill]] %s3229_s26  ;;  %464 = sbr.rel (%p1935_p12) target bundleno = 162 (0xa2), region = 24 }
  0x29   : > { %s3232_s28 = scalar_select %p2833_p11, 1, 0 }
  0x2b   : > { %3233 = sst [smem:[#allocation32_spill]] %s3232_s28 }
  0x2d   : > { %467 = sbr.rel (!%p2814_p4) target bundleno = 64 (0x40), region = 28  ;;  %s468_s24 = sand.u32 (%p2814_p4), 1, %s2659_s15  }
  0x2e   : > { %s1936_s21 = sshll.u32 (%p2814_p4), %s468_s24, 4  ;;  %s469_s29 = scalar_lea.sflag (%p2814_p4), [#allocation3], %s468_s24 }
  0x2f   : > { %s472_s14 = scalar_lea.vmem (%p2814_p4), [#allocation2], %s1936_s21 }
  0x32   : > { %478 = vsyncadd %s469_s29, 128  ;;  %s1937_s20 = sshll.u32 %s2667_s17, 7  ;;  %s484_s22 = sshll.u32 %s472_s14, 4  ;;  %s485_s22 = int_to_ptr.vmem [resolvable:$true] %s484_s22 }
  0x33   : > { %s3234_s0 = sld [smem:[#allocation33_spill]]  ;;  %s2359_s28 = scalar_lea.vmem %s485_s22, 128 }
  0x34   : > { %p2360_p13 = scmp.ne.s32.totalorder %s485_s22, %s2359_s28  ;;  %s2673_s12 = smov [#allocation2]  }
  0x35   : > { %s2361_s11 = sshll.u32 %s2673_s12, 4  ;;  %s2362_s11 = int_to_ptr.vmem [resolvable:$false] %s2361_s11 }
  0x36   : > { %s2363_s10 = scalar_lea.vmem %s2362_s11, 512  ;;  %p2364_p0 = scmp.lt.s32.totalorder %s485_s22, %s2362_s11 }
  0x37   : > { %p2365_p1 = scmp.lt.s32.totalorder %s2363_s10, %s2359_s28 }
  0x39   : > { %s482_s26 = scalar_lea.hbm %s3234_s0, %s1937_s20  ;;  %p2366_p2 = por %p2365_p1, %p2364_p0 }
  0x3b   : > { %p2367_p3 = pnand %p2366_p2, %p2360_p13 }
  0x3d   : > { %2370 = shalt.err (!%p2367_p3)
}
  0x3e   : > { %s2674_s21 = smov 128   ;;  %s2675_s24 = smov 8  }
  0x3f   : > { %490 = dma.hbm_to_vmem [thread:$0]  %s482_s26, 128, %s485_s22, %s469_s29, %s2674_s21, %s2674_s21, %s2675_s24  }
  0x40 PF: > { %s2846_s13 = sand.u32 1, %s2671_s18   ;;  %s2849_s14 = sand.u32 1, %s2659_s15  }
  0x41   : > { %s2852_s12 = sshll.u32 %s2849_s14, 6  ;;  %s2855_s10 = sshll.u32 %s2667_s17, 10 }
  0x42   : > { %s3235_s1 = sld [smem:[#allocation34_spill]]  ;;  %s498_s26 = scalar_lea.vmem [#allocation5], %s2852_s12 }
  0x43   : > { %s505_s28 = sshll.u32 %s498_s26, 4  ;;  %s3209_s20 = scalar_lea.sflag [#allocation6], %s2846_s13  ;;  %s506_s28 = int_to_ptr.vmem [resolvable:$true] %s505_s28 }
  0x44   : > { %s2383_s22 = scalar_lea.vmem %s506_s28, 1024  ;;  %s2676_s21 = smov [#allocation5]  }
  0x45   : > { %p2384_p5 = scmp.ne.s32.totalorder %s506_s28, %s2383_s22  ;;  %s2387_s24 = sshll.u32 %s2676_s21, 4  ;;  %s2388_s24 = int_to_ptr.vmem [resolvable:$false] %s2387_s24 }
  0x46   : > { %s2389_s0 = scalar_lea.vmem %s2388_s24, 2048  ;;  %p2390_p10 = scmp.lt.s32.totalorder %s506_s28, %s2388_s24 }
  0x47   : > { %p2385_p6 = pnand %p2384_p5, %p2814_p4  ;;  %p2391_p12 = scmp.lt.s32.totalorder %s2389_s0, %s2383_s22 }
  0x48   : > { %s504_s29 = scalar_lea.hbm %s3235_s1, %s2855_s10 }
  0x49   : > { %p2386_p7 = pneg %p2385_p6  ;;  %p2392_p13 = por %p2391_p12, %p2390_p10 }
  0x4b   : > { %p2393_p0 = pnand %p2392_p13, %p2386_p7 }
  0x4d   : > { %2396 = shalt.err (!%p2393_p0)
}
  0x4e   : > { %s3212_s11 = smov 64   ;;  %s3213_s27 = smov 4  }
  0x4f   : > { %2155 = dma.hbm_to_vmem [thread:$0]  (%p2814_p4), %s504_s29, 1024, %s506_s28, %s3209_s20, %s3212_s11, %s3212_s11, %s3213_s27  }
  0x50   : > { %s542_s0 = scalar_lea.hbm %s3189_s3, %s2855_s10  ;;  %s536_s22 = scalar_lea.vmem [#allocation8], %s2852_s12 }
  0x51   : > { %s543_s24 = sshll.u32 %s536_s22, 4  ;;  %s3210_s1 = scalar_lea.sflag [#allocation9], %s2846_s13  ;;  %s544_s24 = int_to_ptr.vmem [resolvable:$true] %s543_s24 }
  0x52   : > { %s2409_s15 = scalar_lea.vmem %s544_s24, 1024  ;;  %s2679_s6 = smov [#allocation8]  }
  0x53   : > { %p2410_p1 = scmp.ne.s32.totalorder %s544_s24, %s2409_s15  ;;  %s2413_s4 = sshll.u32 %s2679_s6, 4  ;;  %s2414_s4 = int_to_ptr.vmem [resolvable:$false] %s2413_s4 }
  0x54   : > { %s2415_s16 = scalar_lea.vmem %s2414_s4, 2048  ;;  %p2416_p5 = scmp.lt.s32.totalorder %s544_s24, %s2414_s4 }
  0x55   : > { %p2411_p2 = pnand %p2410_p1, %p2814_p4  ;;  %p2417_p6 = scmp.lt.s32.totalorder %s2415_s16, %s2409_s15 }
  0x57   : > { %p2412_p3 = pneg %p2411_p2  ;;  %p2418_p7 = por %p2417_p6, %p2416_p5 }
  0x59   : > { %p2419_p10 = pnand %p2418_p7, %p2412_p3 }
  0x5b   : > { %2422 = shalt.err (!%p2419_p10)
}
  0x5c   : > { %2157 = dma.hbm_to_vmem [thread:$0]  (%p2814_p4), %s542_s0, 1024, %s544_s24, %s3210_s1, %s3212_s11, %s3212_s11, %s3213_s27  }
  0x5d   : > { %s596_s4 = scalar_lea.hbm %s3193_s7, %s2855_s10  ;;  %s590_s15 = scalar_lea.vmem [#allocation11], %s2852_s12 }
  0x5e   : > { %s597_s16 = sshll.u32 %s590_s15, 4  ;;  %s3211_s28 = scalar_lea.sflag [#allocation12], %s2846_s13  ;;  %s598_s16 = int_to_ptr.vmem [resolvable:$true] %s597_s16 }
  0x5f   : > { %s2435_s26 = scalar_lea.vmem %s598_s16, 1024  ;;  %s2680_s21 = smov [#allocation11]  }
  0x60   : > { %p2436_p12 = scmp.ne.s32.totalorder %s598_s16, %s2435_s26  ;;  %s2439_s22 = sshll.u32 %s2680_s21, 4  ;;  %s2440_s22 = int_to_ptr.vmem [resolvable:$false] %s2439_s22 }
  0x61   : > { %s2441_s20 = scalar_lea.vmem %s2440_s22, 2048  ;;  %p2442_p1 = scmp.lt.s32.totalorder %s598_s16, %s2440_s22 }
  0x62   : > { %p2437_p13 = pnand %p2436_p12, %p2814_p4  ;;  %p2443_p2 = scmp.lt.s32.totalorder %s2441_s20, %s2435_s26 }
  0x64   : > { %p2438_p0 = pneg %p2437_p13  ;;  %p2444_p3 = por %p2443_p2, %p2442_p1 }
  0x66   : > { %p2445_p5 = pnand %p2444_p3, %p2438_p0 }
  0x68   : > { %2448 = shalt.err (!%p2445_p5)
}
  0x69   : > { %2159 = dma.hbm_to_vmem [thread:$0]  (%p2814_p4), %s596_s4, 1024, %s598_s16, %s3211_s28, %s3212_s11, %s3212_s11, %s3213_s27  }
  0x6a   : > { %s1941_s0 = sshll.u32 %s2667_s17, 4  ;;  %s518_s24 = scalar_lea.vmem [#allocation7], %s2849_s14 }
  0x6b   : > { %s525_s6 = sshll.u32 %s518_s24, 4  ;;  %s523_s20 = scalar_lea.hbm %s3188_s2, %s1941_s0  ;;  %s526_s6 = int_to_ptr.vmem [resolvable:$true] %s525_s6 }
  0x6c   : > { %s2461_s26 = scalar_lea.vmem %s526_s6, 16  ;;  %s2681_s21 = smov [#allocation7]  }
  0x6d   : > { %p2462_p6 = scmp.ne.s32.totalorder %s526_s6, %s2461_s26  ;;  %s2465_s22 = sshll.u32 %s2681_s21, 4  ;;  %s2466_s22 = int_to_ptr.vmem [resolvable:$false] %s2465_s22 }
  0x6e   : > { %s2467_s1 = scalar_lea.vmem %s2466_s22, 32  ;;  %p2468_p12 = scmp.lt.s32.totalorder %s526_s6, %s2466_s22 }
  0x6f   : > { %p2463_p7 = pnand %p2462_p6, %p2814_p4  ;;  %p2469_p13 = scmp.lt.s32.totalorder %s2467_s1, %s2461_s26 }
  0x71   : > { %p2464_p10 = pneg %p2463_p7  ;;  %p2470_p0 = por %p2469_p13, %p2468_p12 }
  0x73   : > { %p2471_p1 = pnand %p2470_p0, %p2464_p10 }
  0x75   : > { %2474 = shalt.err (!%p2471_p1)
}
  0x76   : > { %s3236_s4 = scalar_lea.sflag [#allocation6], %s2846_s13  ;;  %s569_s29 = scalar_lea.hbm %s3191_s5, %s2855_s10 }
  0x77   : > { %2156 = dma.hbm_to_vmem [thread:$0]  (%p2814_p4), %s523_s20, 16, %s526_s6, %s3236_s4  }
  0x78   : > { %s563_s15 = scalar_lea.vmem [#allocation10], %s2852_s12  ;;  %s2921_s26 = scalar_lea.hbm %s3194_s8, %s1941_s0 }
  0x79   : > { %s570_s21 = sshll.u32 %s563_s15, 4  ;;  %s2682_s11 = smov [#allocation10]   ;;  %s571_s21 = int_to_ptr.vmem [resolvable:$true] %s570_s21 }
  0x7a   : > { %s2487_s28 = scalar_lea.vmem %s571_s21, 1024  ;;  %s2491_s27 = sshll.u32 %s2682_s11, 4  ;;  %s2492_s27 = int_to_ptr.vmem [resolvable:$false] %s2491_s27 }
  0x7b   : > { %p2488_p2 = scmp.ne.s32.totalorder %s571_s21, %s2487_s28  ;;  %s2493_s6 = scalar_lea.vmem %s2492_s27, 2048 }
  0x7c   : > { %p2494_p6 = scmp.lt.s32.totalorder %s571_s21, %s2492_s27  ;;  %p2495_p7 = scmp.lt.s32.totalorder %s2493_s6, %s2487_s28 }
  0x7d   : > { %p2489_p3 = pnand %p2488_p2, %p2814_p4 }
  0x7e   : > { %p2496_p10 = por %p2495_p7, %p2494_p6 }
  0x7f   : > { %p2490_p5 = pneg %p2489_p3 }
  0x81   : > { %p2497_p12 = pnand %p2496_p10, %p2490_p5 }
  0x83   : > { %2500 = shalt.err (!%p2497_p12)
}
  0x84   : > { %s3237_s12 = smov 4   ;;  %s3238_s10 = smov 64  }
  0x85   : > { %s3239_s0 = scalar_lea.sflag [#allocation9], %s2846_s13  ;;  %s610_s20 = scalar_lea.vmem [#allocation13], %s2849_s14 }
  0x86   : > { %2158 = dma.hbm_to_vmem [thread:$0]  (%p2814_p4), %s569_s29, 1024, %s571_s21, %s3239_s0, %s3238_s10, %s3238_s10, %s3237_s12  }
  0x87   : > { %s617_s11 = sshll.u32 %s610_s20, 4  ;;  %s1952_s4 = sshll.u32 %s2849_s14, 7  ;;  %s618_s11 = int_to_ptr.vmem [resolvable:$true] %s617_s11 }
  0x88   : > { %s2513_s27 = scalar_lea.vmem %s618_s11, 16  ;;  %s2683_s28 = smov [#allocation13]  }
  0x89   : > { %p2514_p13 = scmp.ne.s32.totalorder %s618_s11, %s2513_s27  ;;  %s2517_s16 = sshll.u32 %s2683_s28, 4  ;;  %s2518_s16 = int_to_ptr.vmem [resolvable:$false] %s2517_s16 }
  0x8a   : > { %s2519_s24 = scalar_lea.vmem %s2518_s16, 32  ;;  %p2520_p2 = scmp.lt.s32.totalorder %s618_s11, %s2518_s16 }
  0x8b   : > { %p2515_p0 = pnand %p2514_p13, %p2814_p4  ;;  %p2521_p3 = scmp.lt.s32.totalorder %s2519_s24, %s2513_s27 }
  0x8d   : > { %p2516_p1 = pneg %p2515_p0  ;;  %p2522_p5 = por %p2521_p3, %p2520_p2 }
  0x8f   : > { %p2523_p6 = pnand %p2522_p5, %p2516_p1 }
  0x91   : > { %2526 = shalt.err (!%p2523_p6)
}
  0x92   : > { %s3240_s29 = scalar_lea.sflag [#allocation12], %s2846_s13  ;;  %s2038_s15 = sshll.u32 %s2667_s17, 11 }
  0x93   : > { %2160 = dma.hbm_to_vmem [thread:$0]  (%p2814_p4), %s2921_s26, 16, %s618_s11, %s3240_s29  }
  0x94   : > { %s634_s1 = scalar_lea.hbm %s3195_s9, %s2038_s15  ;;  %s628_s6 = scalar_lea.vmem [#allocation14], %s1952_s4 }
  0x95   : > { %s635_s12 = sshll.u32 %s628_s6, 4  ;;  %s625_s10 = scalar_lea.sflag [#allocation15], %s2849_s14  ;;  %s636_s12 = int_to_ptr.vmem [resolvable:$true] %s635_s12 }
  0x96   : > { %s2539_s0 = scalar_lea.vmem %s636_s12, 2048  ;;  %s2684_s13 = smov [#allocation14]  }
  0x97   : > { %p2540_p7 = scmp.ne.s32.totalorder %s636_s12, %s2539_s0  ;;  %s2543_s20 = sshll.u32 %s2684_s13, 4  ;;  %s2544_s20 = int_to_ptr.vmem [resolvable:$false] %s2543_s20 }
  0x98   : > { %s2545_s27 = scalar_lea.vmem %s2544_s20, 4096  ;;  %p2546_p13 = scmp.lt.s32.totalorder %s636_s12, %s2544_s20 }
  0x99   : > { %p2541_p10 = pnand %p2540_p7, %p2814_p4  ;;  %p2547_p0 = scmp.lt.s32.totalorder %s2545_s27, %s2539_s0 }
  0x9b   : > { %p2542_p12 = pneg %p2541_p10  ;;  %p2548_p1 = por %p2547_p0, %p2546_p13 }
  0x9d   : > { %p2549_p2 = pnand %p2548_p1, %p2542_p12 }
  0x9f   : > { %2552 = shalt.err (!%p2549_p2)
}
  0xa0   : > { %s2685_s26 = smov 128   ;;  %s2686_s11 = smov 8  }
  0xa1   : > { %2161 = dma.hbm_to_vmem [thread:$0]  (%p2814_p4), %s634_s1, 2048, %s636_s12, %s625_s10, %s2685_s26, %s2685_s26, %s2686_s11  }
  0xa2 PF: > { %p1955_p3 = scmp.ge.s32.totalorder %s2671_s18, 1  ;;  %p650_p5 = scmp.lt.s32.totalorder %s2671_s18, 5 }
  0xa4   : > { %p651_p6 = pnand %p1955_p3, %p650_p5 }
  0xa5   : > { %s2953_s14 = sand.u32 (!%p651_p6), 1, %s2655_s30  }
  0xa6   : > { %654 = sbr.rel (%p651_p6) target bundleno = 1518 (0x5ee), region = 72  ;;  %s2956_s4 = sshll.u32 (!%p651_p6), %s2953_s14, 4 }
  0xa7   : > { %s657_s28 = scalar_lea.sflag (!%p651_p6), [#allocation3], %s2953_s14  ;;  %s660_s16 = scalar_lea.vmem (!%p651_p6), [#allocation2], %s2956_s4 }
  0xab   : > { %2622 = dma.done.wait (%p2822_p8), %s657_s28, 256  }
  0xac   : > { %2624 = vsyncadd (%p2822_p8), %s657_s28, 4294967040  ;;  %s665_s23 = sand.u32 1, %s2802_s19   ;;  %s1957_s24 = sshll.u32 %s2953_s14, 6 }
  0xad   : > { %s666_s29 = scalar_lea.sflag [#allocation6], %s665_s23  ;;  %s2966_s15 = scalar_lea.vmem [#allocation5], %s1957_s24 }
  0xae   : > { %2626 = dma.done.wait (%p2822_p8), %s666_s29, 1040  }
  0xaf   : > { %2628 = vsyncadd (%p2822_p8), %s666_s29, 4294966256  ;;  %s677_s21 = scalar_lea.vmem [#allocation7], %s2953_s14  ;;  %s683_s22 = scalar_lea.sflag [#allocation9], %s665_s23 }
  0xb0   : > { %s2973_s1 = scalar_lea.vmem [#allocation8], %s1957_s24 }
  0xb1   : > { %2630 = dma.done.wait (%p2822_p8), %s683_s22, 2048  }
  0xb2   : > { %2632 = vsyncadd (%p2822_p8), %s683_s22, 4294965248  ;;  %s2979_s19 = scalar_lea.vmem [#allocation10], %s1957_s24  ;;  %s701_s6 = scalar_lea.sflag [#allocation12], %s665_s23 }
  0xb3   : > { %s2981_s12 = scalar_lea.vmem [#allocation11], %s1957_s24 }
  0xb4   : > { %2634 = dma.done.wait (%p2822_p8), %s701_s6, 1040  }
  0xb5   : > { %2636 = vsyncadd (%p2822_p8), %s701_s6, 4294966256  ;;  %s1961_s10 = sshll.u32 %s2953_s14, 7  ;;  %s712_s0 = scalar_lea.vmem [#allocation13], %s2953_s14 }
  0xb6   : > { %s718_s13 = scalar_lea.sflag [#allocation15], %s2953_s14  ;;  %s2990_s20 = scalar_lea.vmem [#allocation14], %s1961_s10 }
  0xb7   : > { %2638 = dma.done.wait (%p2822_p8), %s718_s13, 2048  }
  0xb8   : > { %2640 = vsyncadd (%p2822_p8), %s718_s13, 4294965248  ;;  %v2687_v0 = vmov 0.0   ;;  %vm2688_vm0 = vmmov 0   ;;  %v2241_v1 = vld [vmem:[%s2966_s15 + $0x38] sm:$0xff]   ;;  %v2242_v2 = vld [vmem:[%s2966_s15 + $0x30] sm:$0xff]   ;;  %vm837_vm1 = vcmask 97280  }
  0xb9   : > { %2075 = vmatprep.subr.bf16.mxu0 %v2687_v0  ;;  %2091 = vmatprep.mubr.msk.bf16.mxu0 %vm2688_vm0, %v2687_v0  ;;  %v2243_v3 = vld [vmem:[%s2966_s15 + $0x28] sm:$0xff]   ;;  %v2244_v4 = vld [vmem:[%s2966_s15 + $0x20] sm:$0xff]   ;;  %v2245_v5 = vld [vmem:[%s2966_s15 + $0x18] sm:$0xff]   ;;  %s3241_s25 = sld [smem:[#allocation28_spill]]  ;;  %vm1583_vm2 = vcmask 72704   ;;  %s3122_s27 = scalar_lea.vmem [#allocation17], %s2956_s4 }
  0xba   : > { %2095 = vmatprep.subr.bf16.mxu1 %v2687_v0  ;;  %2111 = vmatprep.mubr.msk.bf16.mxu1 %vm2688_vm0, %v2687_v0  ;;  %v2246_v6 = vld [vmem:[%s2966_s15 + $0x10] sm:$0xff]   ;;  %v2247_v7 = vld [vmem:[%s2966_s15 + $0x8] sm:$0xff]   ;;  %v2248_v8 = vld [vmem:[%s2966_s15] sm:$0xff]   ;;  %s3242_s11 = sld [smem:[#allocation35_spill]]  ;;  %s1593_s26 = scalar_lea.sflag [#allocation4], %s2953_s14 }
  0xbb   : > { %2076 = vmatpush3.bf16.msra.mxu0 %v2241_v1  ;;  %v834_v9 = vld [vmem:[%s660_s16] sm:$0xff]  ;;  %v835_v10 = vld [vmem:[%s660_s16 + $0x8] sm:$0xff]  ;;  %s3243_s24 = sld [smem:[#allocation36_spill]] }
  0xbc   : > { %2077 = vmatprep.subr.bf16.mxu0 %v2687_v0  ;;  %v836_v11 = vpack.c.bf16 %v835_v10, %v834_v9  ;;  %v2249_v12 = vld [vmem:[%s2973_s1 + $0x38] sm:$0xff]   ;;  %v2250_v13 = vld [vmem:[%s2973_s1 + $0x30] sm:$0xff]   ;;  %v2251_v14 = vld [vmem:[%s2973_s1 + $0x28] sm:$0xff]   ;;  %s3245_s10 = sld [smem:[#allocation38_spill]] }
  0xbd   : > { %2096 = vmatpush3.bf16.msra.mxu1 %v2249_v12  ;;  %v2252_v15 = vld [vmem:[%s2973_s1 + $0x20] sm:$0xff]   ;;  %v2253_v16 = vld [vmem:[%s2973_s1 + $0x18] sm:$0xff]   ;;  %v2254_v17 = vld [vmem:[%s2973_s1 + $0x10] sm:$0xff]  }
  0xbe   : > { %2097 = vmatprep.subr.bf16.mxu1 %v2687_v0  ;;  %v2255_v18 = vld [vmem:[%s2973_s1 + $0x8] sm:$0xff]   ;;  %v2256_v19 = vld [vmem:[%s2973_s1] sm:$0xff]   ;;  %v1965_v20 = vld [vmem:[%s677_s21] ss:$0 sm:$0xff]  ;;  %s3244_s1 = sld [smem:[#allocation37_spill]] }
  0xbf   : > { %2078 = vmatpush3.bf16.msra.mxu0 %v2242_v2  ;;  %v2257_v38 = vld [vmem:[%s2979_s19 + $0x38] sm:$0xff]   ;;  %v2258_v39 = vld [vmem:[%s2979_s19 + $0x30] sm:$0xff]   ;;  %v2259_v40 = vld [vmem:[%s2979_s19 + $0x28] sm:$0xff]   ;;  %p817_p4 = scmp.lt.s32.totalorder %s3241_s25, 3 }
  0xc0   : > { %2079 = vmatprep.subr.bf16.mxu0 %v2687_v0  ;;  %v2260_v41 = vld [vmem:[%s2979_s19 + $0x20] sm:$0xff]   ;;  %v2261_v42 = vld [vmem:[%s2979_s19 + $0x18] sm:$0xff]   ;;  %v2262_v43 = vld [vmem:[%s2979_s19 + $0x10] sm:$0xff]  }
  0xc1   : > { %2098 = vmatpush3.bf16.msra.mxu1 %v2250_v13  ;;  %v2263_v44 = vld [vmem:[%s2979_s19 + $0x8] sm:$0xff]   ;;  %v2264_v45 = vld [vmem:[%s2979_s19] sm:$0xff]   ;;  %s3266_s25 = smov (!%p817_p4, %s3241_s25), 3  ;;  %v2265_v1 = vld [vmem:[%s2981_s12 + $0x38] sm:$0xff]  }
  0xc2   : > { %2099 = vmatprep.subr.bf16.mxu1 %v2687_v0  ;;  %s819_s28 = scalar_lea.vmem %s3242_s11, %s3266_s25  ;;  %v2266_v2 = vld [vmem:[%s2981_s12 + $0x30] sm:$0xff]   ;;  %s822_s29 = scalar_lea.vmem %s3243_s24, %s3266_s25 }
  0xc3   : > { %2080 = vmatpush3.bf16.msra.mxu0 %v2243_v3  ;;  %v1977_v46 = vld [vmem:[%s819_s28] ss:$0 sm:$0xff]  ;;  %v2267_v3 = vld [vmem:[%s2981_s12 + $0x28] sm:$0xff]   ;;  %s1964_s15 = sshll.u32 %s3266_s25, 1  ;;  %s3246_s25 = sld [smem:[#allocation39_spill]] }
  0xc4   : > { %2081 = vmatprep.subr.bf16.mxu0 %v2687_v0  ;;  %v1988_v9 = vld [vmem:[%s822_s29] ss:$0 sm:$0xff]  ;;  %s826_s19 = scalar_lea.vmem %s3244_s1, %s1964_s15  ;;  %s1598_s11 = scalar_lea.sflag [#allocation18], %s2953_s14 }
  0xc5   : > { %2100 = vmatpush3.bf16.msra.mxu1 %v2251_v14 }
  0xc6   : > { %2101 = vmatprep.subr.bf16.mxu1 %v2687_v0 }
  0xc7   : > { %2082 = vmatpush3.bf16.msra.mxu0 %v2244_v4  ;;  %v2268_v4 = vld [vmem:[%s2981_s12 + $0x20] sm:$0xff]  }
  0xc8   : > { %2083 = vmatprep.subr.bf16.mxu0 %v2687_v0 }
  0xc9   : > { %2102 = vmatpush3.bf16.msra.mxu1 %v2252_v15 }
  0xca   : > { %2103 = vmatprep.subr.bf16.mxu1 %v2687_v0 }
  0xcb   : > { %2084 = vmatpush3.bf16.msra.mxu0 %v2245_v5  ;;  %v2269_v5 = vld [vmem:[%s2981_s12 + $0x18] sm:$0xff]  }
  0xcc   : > { %2085 = vmatprep.subr.bf16.mxu0 %v2687_v0 }
  0xcd   : > { %2104 = vmatpush3.bf16.msra.mxu1 %v2253_v16 }
  0xce   : > { %2105 = vmatprep.subr.bf16.mxu1 %v2687_v0 }
  0xcf   : > { %2086 = vmatpush3.bf16.msra.mxu0 %v2246_v6  ;;  %v2270_v6 = vld [vmem:[%s2981_s12 + $0x10] sm:$0xff]  }
  0xd0   : > { %2087 = vmatprep.subr.bf16.mxu0 %v2687_v0 }
  0xd1   : > { %2106 = vmatpush3.bf16.msra.mxu1 %v2254_v17 }
  0xd2   : > { %2107 = vmatprep.subr.bf16.mxu1 %v2687_v0 }
  0xd3   : > { %2088 = vmatpush3.bf16.msra.mxu0 %v2247_v7  ;;  %v2271_v7 = vld [vmem:[%s2981_s12 + $0x8] sm:$0xff]  }
  0xd4   : > { %2089 = vmatprep.subr.bf16.mxu0 %v2687_v0 }
  0xd5   : > { %2108 = vmatpush3.bf16.msra.mxu1 %v2255_v18 }
  0xd6   : > { %2109 = vmatprep.subr.bf16.mxu1 %v2687_v0 }
  0xd7   : > { %2090 = vmatpush3.bf16.msra.mxu0 %v2248_v8  ;;  %v2272_v8 = vld [vmem:[%s2981_s12] sm:$0xff]  }
  0xd8   : > { %2115 = vmatprep.subr.bf16.mxu0 %v2687_v0 }
  0xd9   : > { %2110 = vmatpush3.bf16.msra.mxu1 %v2256_v19 }
  0xda   : > { %2092 = vmatmul.mubr.msk.bf16.vlgmr.msra.gmra.mxu0 %vm837_vm1, %v836_v11  ;;  %2135 = vmatprep.subr.bf16.mxu1 %v2687_v0 }
  0xdb   : > { %2131 = vmatprep.mubr.msk.bf16.mxu0 %vm2688_vm0, %v2687_v0  ;;  %2116 = vmatpush3.bf16.msra.mxu0 %v2257_v38  ;;  %v2293_v38 = vld [vmem:[%s2990_s20 + $0x14] ss:$8 sps:$4 sm:$0xff]  }
  0xdc   : > { %2117 = vmatprep.subr.bf16.mxu0 %v2687_v0 }
  0xdf   : > { %2118 = vmatpush3.bf16.msra.mxu0 %v2258_v39  ;;  %v2291_v39 = vld [vmem:[%s2990_s20 + $0x10] ss:$8 sps:$4 sm:$0xff]  }
  0xe0   : > { %2119 = vmatprep.subr.bf16.mxu0 %v2687_v0 }
  0xe3   : > { %2120 = vmatpush3.bf16.msra.mxu0 %v2259_v40  ;;  %v2296_v40 = vld [vmem:[%s2990_s20 + $0x4] ss:$8 sps:$4 sm:$0xff]  }
  0xe4   : > { %2121 = vmatprep.subr.bf16.mxu0 %v2687_v0 }
  0xe7   : > { %2122 = vmatpush3.bf16.msra.mxu0 %v2260_v41  ;;  %v2294_v41 = vld [vmem:[%s2990_s20] ss:$8 sps:$4 sm:$0xff]  }
  0xe8   : > { %2123 = vmatprep.subr.bf16.mxu0 %v2687_v0 }
  0xeb   : > { %2124 = vmatpush3.bf16.msra.mxu0 %v2261_v42  ;;  %v2689_v42 = vmov 0  }
  0xec   : > { %2125 = vmatprep.subr.bf16.mxu0 %v2687_v0 }
  0xef   : > { %2126 = vmatpush3.bf16.msra.mxu0 %v2262_v43  ;;  %v1999_v43 = vld [vmem:[%s712_s0] ss:$0 sm:$0xff]  ;;  %s3112_s0 = scalar_lea.vmem [#allocation16], %s2956_s4 }
  0xf0   : > { %2127 = vmatprep.subr.bf16.mxu0 %v2687_v0 }
  0xf3   : > { %2128 = vmatpush3.bf16.msra.mxu0 %v2263_v44 }
  0xf4   : > { %2129 = vmatprep.subr.bf16.mxu0 %v2687_v0 }
  0xf7   : > { %2130 = vmatpush3.bf16.msra.mxu0 %v2264_v45 }
 0x19a   : > { %v947_v21 = vpop.f32.mrf.mxu0 }
 0x19b   : > { %v948_v22 = vadd.f32 %v1965_v20, %v947_v21 }
 0x19c   : > { %v2093_v23 = vpop.f32.mrf.mxu0 }
 0x19d   : > { %v1975_v24 = vmul.f32 -1.442695, %v948_v22 }
 0x19e   : > { %v950_v25 = vpop.f32.mrf.mxu0 }
 0x19f   : > { %2297 = vpow2.f32 %v1975_v24  ;;  %v951_v26 = vadd.f32 %v1965_v20, %v950_v25 }
 0x1a0   : > { %v2094_v27 = vpop.f32.mrf.mxu0 }
 0x1a1   : > { %v1976_v28 = vmul.f32 -1.442695, %v951_v26  ;;  %v2273_v27 = vld [vmem:[%s2990_s20 + $0x70] ss:$8 sps:$4 sm:$0xff]  }
 0x1a3   : > { %2299 = vpow2.f32 %v1976_v28  ;;  %v2278_v28 = vld [vmem:[%s2990_s20 + $0x64] ss:$8 sps:$4 sm:$0xff]  }
 0x1ac   : > { %v2298_v29 = vpop.eup %2297 }
 0x1ad   : > { %v960_v30 = vadd.f32 1.0, %v2298_v29  ;;  %v2276_v29 = vld [vmem:[%s2990_s20 + $0x60] ss:$8 sps:$4 sm:$0xff]  }
 0x1af   : > { %2301 = vrcp.f32 %v960_v30  ;;  %v2281_v30 = vld [vmem:[%s2990_s20 + $0x54] ss:$8 sps:$4 sm:$0xff]  }
 0x1b0   : > { %v2300_v31 = vpop.eup %2299 }
 0x1b1   : > { %v961_v32 = vadd.f32 1.0, %v2300_v31  ;;  %v2279_v31 = vld [vmem:[%s2990_s20 + $0x50] ss:$8 sps:$4 sm:$0xff]  }
 0x1b3   : > { %2303 = vrcp.f32 %v961_v32  ;;  %v2284_v32 = vld [vmem:[%s2990_s20 + $0x44] ss:$8 sps:$4 sm:$0xff]  }
 0x1bc   : > { %v2302_v33 = vpop.eup %2301 }
 0x1bd   : > { %v966_v35 = vmul.f32 %v2302_v33, %v948_v22  ;;  %v2282_v33 = vld [vmem:[%s2990_s20 + $0x40] ss:$8 sps:$4 sm:$0xff]  }
 0x1c0   : > { %v2304_v34 = vpop.eup %2303 }
 0x1c1   : > { %v967_v36 = vmul.f32 %v2304_v34, %v951_v26  ;;  %v2275_v26 = vld [vmem:[%s2990_s20 + $0x74] ss:$8 sps:$4 sm:$0xff]  }
 0x1c2   : > { %1458 = vmatprep.subr.bf16.mxu0 %v2275_v26  ;;  %v2287_v34 = vld [vmem:[%s2990_s20 + $0x34] ss:$8 sps:$4 sm:$0xff]  }
 0x1c3   : > { %v968_v37 = vpack.c.bf16 %v967_v36, %v966_v35  ;;  %v2285_v35 = vld [vmem:[%s2990_s20 + $0x30] ss:$8 sps:$4 sm:$0xff]   ;;  %v2290_v36 = vld [vmem:[%s2990_s20 + $0x24] ss:$8 sps:$4 sm:$0xff]  }
 0x1c5   : > { %2112 = vmatmul.mubr.bf16.vlgmr.msra.gmra.mxu1 %v968_v37  ;;  %v2288_v37 = vld [vmem:[%s2990_s20 + $0x20] ss:$8 sps:$4 sm:$0xff]  }
 0x1c6   : > { %2151 = vmatprep.mubr.msk.bf16.mxu1 %vm2688_vm0, %v2687_v0  ;;  %2136 = vmatpush3.bf16.msra.mxu1 %v2265_v1  ;;  %v1366_v1 = vld [vmem:[%s826_s19] sm:$0x3] }
 0x1c7   : > { %2137 = vmatprep.subr.bf16.mxu1 %v2687_v0 }
 0x1ca   : > { %2138 = vmatpush3.bf16.msra.mxu1 %v2266_v2 }
 0x1cb   : > { %2139 = vmatprep.subr.bf16.mxu1 %v2687_v0 }
 0x1ce   : > { %2140 = vmatpush3.bf16.msra.mxu1 %v2267_v3 }
 0x1cf   : > { %2141 = vmatprep.subr.bf16.mxu1 %v2687_v0 }
 0x1d2   : > { %2142 = vmatpush3.bf16.msra.mxu1 %v2268_v4 }
 0x1d3   : > { %2143 = vmatprep.subr.bf16.mxu1 %v2687_v0 }
 0x1d6   : > { %2144 = vmatpush3.bf16.msra.mxu1 %v2269_v5 }
 0x1d7   : > { %2145 = vmatprep.subr.bf16.mxu1 %v2687_v0 }
 0x1da   : > { %2146 = vmatpush3.bf16.msra.mxu1 %v2270_v6 }
 0x1db   : > { %2147 = vmatprep.subr.bf16.mxu1 %v2687_v0 }
 0x1de   : > { %2148 = vmatpush3.bf16.msra.mxu1 %v2271_v7 }
 0x1df   : > { %2149 = vmatprep.subr.bf16.mxu1 %v2687_v0 }
 0x1e2   : > { %2150 = vmatpush3.bf16.msra.mxu1 %v2272_v8  ;;  %v2026_v8 = vld [vmem:[%s3245_s10] ss:$0 sm:$0xff] }
 0x285   : > { %v1074_v47 = vpop.f32.mrf.mxu1 }
 0x286   : > { %v1075_v48 = vadd.f32 %v1977_v46, %v1074_v47 }
 0x287   : > { %v2113_v49 = vpop.f32.mrf.mxu1 }
 0x288   : > { %v1986_v50 = vmul.f32 -1.442695, %v1075_v48 }
 0x289   : > { %v1077_v51 = vpop.f32.mrf.mxu1 }
 0x28a   : > { %2305 = vpow2.f32 %v1986_v50  ;;  %v1078_v52 = vadd.f32 %v1977_v46, %v1077_v51 }
 0x28b   : > { %v2114_v53 = vpop.f32.mrf.mxu1 }
 0x28c   : > { %v1987_v54 = vmul.f32 -1.442695, %v1078_v52 }
 0x28e   : > { %2307 = vpow2.f32 %v1987_v54 }
 0x297   : > { %v2306_v55 = vpop.eup %2305 }
 0x298   : > { %v1087_v56 = vadd.f32 1.0, %v2306_v55 }
 0x29a   : > { %2309 = vrcp.f32 %v1087_v56 }
 0x29b   : > { %v2308_v57 = vpop.eup %2307 }
 0x29c   : > { %v1088_v58 = vadd.f32 1.0, %v2308_v57 }
 0x29e   : > { %2311 = vrcp.f32 %v1088_v58 }
 0x2a7   : > { %v2310_v59 = vpop.eup %2309 }
 0x2a8   : > { %v1093_v61 = vmul.f32 %v2310_v59, %v1075_v48 }
 0x2ab   : > { %v2312_v60 = vpop.eup %2311 }
 0x2ac   : > { %v1094_v62 = vmul.f32 %v2312_v60, %v1078_v52 }
 0x2ae   : > { %v1095_v63 = vpack.c.bf16 %v1094_v62, %v1093_v61  ;;  %v1368_v61 = vlaneseq }
 0x2b0   : > { %2132 = vmatmul.mubr.bf16.vlgmr.msra.gmra.mxu0 %v1095_v63  ;;  %v1369_v62 = vshrl.u32 %v1368_v61, 7 }
 0x2b1   : > { %1459 = vmatpush1.bf16.msra.mxu0 %v2273_v27  ;;  %1490 = vmatprep.mubr.bf16.mxu0 %v2689_v42 }
 0x2b2   : > { %1460 = vmatprep.subr.bf16.mxu0 %v2278_v28  ;;  %v1370_v63 = vsub.s32 0, %v1369_v62  ;;  %v1374_v2 = vsub.s32 1, %v1369_v62 }
 0x2b4   : > { %v1371_v3 = vrot.slane %v1366_v1, %v1370_v63  ;;  %v1375_v4 = vrot.slane %v1366_v1, %v1374_v2 }
 0x2b5   : > { %1461 = vmatpush1.bf16.msra.mxu0 %v2276_v29 }
 0x2b6   : > { %1462 = vmatprep.subr.bf16.mxu0 %v2281_v30 }
 0x2b9   : > { %1463 = vmatpush1.bf16.msra.mxu0 %v2279_v31 }
 0x2ba   : > { %1464 = vmatprep.subr.bf16.mxu0 %v2284_v32 }
 0x2bd   : > { %1465 = vmatpush1.bf16.msra.mxu0 %v2282_v33 }
 0x2be   : > { %1466 = vmatprep.subr.bf16.mxu0 %v2287_v34 }
 0x2c1   : > { %1467 = vmatpush1.bf16.msra.mxu0 %v2285_v35 }
 0x2c2   : > { %1468 = vmatprep.subr.bf16.mxu0 %v2290_v36 }
 0x2c5   : > { %1469 = vmatpush1.bf16.msra.mxu0 %v2288_v37 }
 0x2c6   : > { %1470 = vmatprep.subr.bf16.mxu0 %v2293_v38  ;;  %v2027_v38 = vld [vmem:[%s3246_s25] ss:$0 sm:$0xff] }
 0x2c9   : > { %1471 = vmatpush1.bf16.msra.mxu0 %v2291_v39 }
 0x2ca   : > { %1472 = vmatprep.subr.bf16.mxu0 %v2296_v40 }
 0x2cd   : > { %1473 = vmatpush1.bf16.msra.mxu0 %v2294_v41 }
 0x370   : > { %v1201_v10 = vpop.f32.mrf.mxu0 }
 0x371   : > { %v1202_v11 = vadd.f32 %v1988_v9, %v1201_v10 }
 0x372   : > { %v2133_v12 = vpop.f32.mrf.mxu0 }
 0x373   : > { %v1997_v13 = vmul.f32 -1.442695, %v1202_v11 }
 0x374   : > { %v1204_v14 = vpop.f32.mrf.mxu0 }
 0x375   : > { %2313 = vpow2.f32 %v1997_v13  ;;  %v1205_v15 = vadd.f32 %v1988_v9, %v1204_v14 }
 0x376   : > { %v2134_v16 = vpop.f32.mrf.mxu0 }
 0x377   : > { %v1998_v17 = vmul.f32 -1.442695, %v1205_v15 }
 0x379   : > { %2315 = vpow2.f32 %v1998_v17 }
 0x382   : > { %v2314_v0 = vpop.eup %2313 }
 0x383   : > { %v1214_v18 = vadd.f32 1.0, %v2314_v0 }
 0x385   : > { %2317 = vrcp.f32 %v1214_v18 }
 0x386   : > { %v2316_v19 = vpop.eup %2315 }
 0x387   : > { %v1215_v20 = vadd.f32 1.0, %v2316_v19 }
 0x389   : > { %2319 = vrcp.f32 %v1215_v20 }
 0x392   : > { %v2318_v21 = vpop.eup %2317 }
 0x393   : > { %v1220_v23 = vmul.f32 %v2318_v21, %v1202_v11 }
 0x396   : > { %v2320_v22 = vpop.eup %2319 }
 0x397   : > { %v1221_v24 = vmul.f32 %v2320_v22, %v1205_v15 }
 0x399   : > { %v1222_v25 = vpack.c.bf16 %v1221_v24, %v1220_v23 }
 0x39b   : > { %2152 = vmatmul.mubr.bf16.vlgmr.msra.gmra.mxu1 %v1222_v25 }
 0x45b   : > { %v1328_v44 = vpop.f32.mrf.mxu1 }
 0x45c   : > { %v1329_v45 = vadd.f32 %v1999_v43, %v1328_v44 }
 0x45d   : > { %v2153_v46 = vpop.f32.mrf.mxu1 }
 0x45e   : > { %v2008_v47 = vmul.f32 -1.442695, %v1329_v45 }
 0x45f   : > { %v1331_v48 = vpop.f32.mrf.mxu1 }
 0x460   : > { %2321 = vpow2.f32 %v2008_v47  ;;  %v1332_v49 = vadd.f32 %v1999_v43, %v1331_v48 }
 0x461   : > { %v2154_v50 = vpop.f32.mrf.mxu1 }
 0x462   : > { %v2009_v51 = vmul.f32 -1.442695, %v1332_v49 }
 0x464   : > { %2323 = vpow2.f32 %v2009_v51 }
 0x46d   : > { %v2322_v52 = vpop.eup %2321 }
 0x46e   : > { %v1341_v53 = vadd.f32 1.0, %v2322_v52 }
 0x470   : > { %2325 = vrcp.f32 %v1341_v53 }
 0x471   : > { %v2324_v54 = vpop.eup %2323 }
 0x472   : > { %v1342_v55 = vadd.f32 1.0, %v2324_v54 }
 0x474   : > { %2327 = vrcp.f32 %v1342_v55 }
 0x47d   : > { %v2326_v56 = vpop.eup %2325 }
 0x47e   : > { %v1347_v58 = vmul.f32 %v2326_v56, %v1329_v45 }
 0x481   : > { %v2328_v57 = vpop.eup %2327 }
 0x482   : > { %v1348_v59 = vmul.f32 %v2328_v57, %v1332_v49 }
 0x484   : > { %v1349_v60 = vpack.c.bf16 %v1348_v59, %v1347_v58 }
 0x486   : > { %1491 = vmatmul.mubr.bf16.vlgmr.msra.gmra.mxu0 %v1349_v60 }
 0x546   : > { %v1492_v5 = vpop.f32.mrf.mxu0 }
 0x547   : > { %v1493_v6 = vadd.f32 %v1492_v5, %v1371_v3 }
 0x548   : > { %v1494_v7 = vpop.f32.mrf.mxu0 }
 0x549   : > { %1584 = vst.msk [vmem:[%s3112_s0] sm:$0xff] %vm1583_vm2, %v1493_v6  ;;  %v1495_v9 = vadd.f32 %v1494_v7, %v1375_v4 }
 0x54a   : > { %v1496_v10 = vpop.f32.mrf.mxu0 }
 0x54b   : > { %v1509_v11 = vsub.f32 %v2026_v8, %v1495_v9  ;;  %v1497_v12 = vadd.f32 %v1496_v10, %v1371_v3 }
 0x54c   : > { %v1498_v13 = vpop.f32.mrf.mxu0 }
 0x54d   : > { %v1513_v14 = vand.u32 2147483647, %v1509_v11  ;;  %1585 = vst.msk [vmem:[%s3112_s0 + $0x8] sm:$0xff] %vm1583_vm2, %v1497_v12  ;;  %v1499_v15 = vadd.f32 %v1498_v13, %v1375_v4  ;;  %v1511_v33 = vmax.f32 %v1509_v11, 0.0 }
 0x54f   : > { %v1515_v16 = vsub.f32 0.0, %v1513_v14  ;;  %v1510_v17 = vsub.f32 %v2026_v8, %v1499_v15 }
 0x551   : > { %v1517_v0 = vmul.f32 1.442695, %v1515_v16  ;;  %v1514_v18 = vand.u32 2147483647, %v1510_v17  ;;  %v1512_v42 = vmax.f32 %v1510_v17, 0.0 }
 0x553   : > { %2329 = vpow2.f32 %v1517_v0  ;;  %v1516_v19 = vsub.f32 0.0, %v1514_v18 }
 0x555   : > { %v1519_v20 = vmul.f32 1.442695, %v1516_v19 }
 0x557   : > { %2331 = vpow2.f32 %v1519_v20 }
 0x560   : > { %v2330_v21 = vpop.eup %2329 }
 0x561   : > { %v1521_v22 = vadd.f32 1.0, %v2330_v21  ;;  %v1524_v25 = vmul.f32 -0.5, %v2330_v21  ;;  %v1527_v28 = vand.u32 2147483647, %v2330_v21 }
 0x563   : > { %2333 = vlog2.f32 %v1521_v22  ;;  %v1525_v26 = vadd.f32 1.0, %v1524_v25  ;;  %vm1528_vm3 = vcmp.lt.f32.partialorder %v1527_v28, 0.0004427343 }
 0x564   : > { %v2332_v23 = vpop.eup %2331 }
 0x565   : > { %v1530_v24 = vadd.f32 1.0, %v2332_v23  ;;  %v1533_v27 = vmul.f32 -0.5, %v2332_v23  ;;  %v1526_v31 = vmul.f32 %v2330_v21, %v1525_v26  ;;  %v1536_v34 = vand.u32 2147483647, %v2332_v23 }
 0x567   : > { %2335 = vlog2.f32 %v1530_v24  ;;  %v1534_v32 = vadd.f32 1.0, %v1533_v27  ;;  %vm1537_vm4 = vcmp.lt.f32.partialorder %v1536_v34, 0.0004427343 }
 0x569   : > { %v1535_v40 = vmul.f32 %v2332_v23, %v1534_v32 }
 0x570   : > { %v2334_v29 = vpop.eup %2333 }
 0x571   : > { %v1523_v30 = vmul.f32 0.6931472, %v2334_v29 }
 0x573   : > { %v1529_v35 = vsel %vm1528_vm3, %v1526_v31, %v1523_v30 }
 0x574   : > { %v2336_v36 = vpop.eup %2335  ;;  %v1539_v37 = vadd.f32 %v1529_v35, %v1511_v33 }
 0x575   : > { %v1532_v39 = vmul.f32 0.6931472, %v2336_v36 }
 0x576   : > { %v1541_v41 = vsub.f32 %v2026_v8, %v1539_v37 }
 0x577   : > { %v1538_v43 = vsel %vm1537_vm4, %v1535_v40, %v1532_v39 }
 0x578   : > { %v1549_v44 = vsub.f32 %v1541_v41, %v2027_v38  ;;  %v1540_v45 = vadd.f32 %v1538_v43, %v1512_v42 }
 0x57a   : > { %v1553_v46 = vand.u32 2147483647, %v1549_v44  ;;  %v1542_v47 = vsub.f32 %v2026_v8, %v1540_v45  ;;  %v1551_v3 = vmax.f32 %v1549_v44, 0.0 }
 0x57c   : > { %v1555_v48 = vsub.f32 0.0, %v1553_v46  ;;  %v1550_v49 = vsub.f32 %v1542_v47, %v2027_v38 }
 0x57e   : > { %v1557_v50 = vmul.f32 1.442695, %v1555_v48  ;;  %v1554_v51 = vand.u32 2147483647, %v1550_v49  ;;  %v1552_v11 = vmax.f32 %v1550_v49, 0.0 }
 0x580   : > { %2337 = vpow2.f32 %v1557_v50  ;;  %v1556_v52 = vsub.f32 0.0, %v1554_v51 }
 0x582   : > { %v1559_v53 = vmul.f32 1.442695, %v1556_v52 }
 0x584   : > { %2339 = vpow2.f32 %v1559_v53 }
 0x58d   : > { %v2338_v54 = vpop.eup %2337 }
 0x58e   : > { %v1561_v55 = vadd.f32 1.0, %v2338_v54  ;;  %v1564_v58 = vmul.f32 -0.5, %v2338_v54  ;;  %v1567_v61 = vand.u32 2147483647, %v2338_v54 }
 0x590   : > { %2341 = vlog2.f32 %v1561_v55  ;;  %v1565_v59 = vadd.f32 1.0, %v1564_v58  ;;  %vm1568_vm5 = vcmp.lt.f32.partialorder %v1567_v61, 0.0004427343 }
 0x591   : > { %v2340_v56 = vpop.eup %2339 }
 0x592   : > { %v1570_v57 = vadd.f32 1.0, %v2340_v56  ;;  %v1573_v60 = vmul.f32 -0.5, %v2340_v56  ;;  %v1566_v1 = vmul.f32 %v2338_v54, %v1565_v59  ;;  %v1576_v4 = vand.u32 2147483647, %v2340_v56 }
 0x594   : > { %2343 = vlog2.f32 %v1570_v57  ;;  %v1574_v2 = vadd.f32 1.0, %v1573_v60  ;;  %vm1577_vm6 = vcmp.lt.f32.partialorder %v1576_v4, 0.0004427343 }
 0x596   : > { %v1575_v9 = vmul.f32 %v2340_v56, %v1574_v2 }
 0x59d   : > { %v2342_v62 = vpop.eup %2341 }
 0x59e   : > { %v1563_v63 = vmul.f32 0.6931472, %v2342_v62 }
 0x5a0   : > { %v1569_v5 = vsel %vm1568_vm5, %v1566_v1, %v1563_v63 }
 0x5a1   : > { %v2344_v6 = vpop.eup %2343  ;;  %v1579_v7 = vadd.f32 %v1569_v5, %v1551_v3 }
 0x5a2   : > { %v1572_v8 = vmul.f32 0.6931472, %v2344_v6 }
 0x5a3   : > { %v1581_v10 = vadd.f32 %v2027_v38, %v1579_v7 }
 0x5a4   : > { %v1578_v12 = vsel %vm1577_vm6, %v1575_v9, %v1572_v8 }
 0x5a5   : > { %v1586_v13 = vmul.f32 1.442695, %v1581_v10  ;;  %v1580_v14 = vadd.f32 %v1578_v12, %v1552_v11 }
 0x5a7   : > { %2345 = vpow2.f32 %v1586_v13  ;;  %v1582_v15 = vadd.f32 %v2027_v38, %v1580_v14 }
 0x5a9   : > { %v1588_v16 = vmul.f32 1.442695, %v1582_v15 }
 0x5ab   : > { %2347 = vpow2.f32 %v1588_v16 }
 0x5b4   : > { %v2346_v17 = vpop.eup %2345 }
 0x5b5   : > { %1590 = vst.msk [vmem:[%s3122_s27] sm:$0xff] %vm1583_vm2, %v2346_v17  ;;  %1604 = sbr.rel (!%p2826_p9) target bundleno = 1490 (0x5d2), region = 108 }
 0x5b8   : > { %v2348_v0 = vpop.eup %2347 }
 0x5b9   : > { %1591 = vst.msk [vmem:[%s3122_s27 + $0x8] sm:$0xff] %vm1583_vm2, %v2348_v0 }
 0x5ba   : > { %1610 = vsyncadd %s1593_s26, 128  ;;  %s3248_s16 = sld [smem:[#allocation28_spill]]  ;;  %s1616_s4 = sshll.u32 %s3112_s0, 4  ;;  %s1617_s4 = int_to_ptr.vmem [resolvable:$true] %s1616_s4 }
 0x5bb   : > { %s3249_s15 = sld [smem:[#allocation40_spill]]  ;;  %s2553_s1 = scalar_lea.vmem %s1617_s4, 128 }
 0x5bc   : > { %p2554_p8 = scmp.ne.s32.totalorder %s1617_s4, %s2553_s1  ;;  %s2690_s19 = smov [#allocation16]  }
 0x5bd   : > { %s2555_s6 = sshll.u32 %s2690_s19, 4  ;;  %s2556_s6 = int_to_ptr.vmem [resolvable:$false] %s2555_s6 }
 0x5be   : > { %s2557_s12 = scalar_lea.vmem %s2556_s6, 512  ;;  %p2558_p7 = scmp.lt.s32.totalorder %s1617_s4, %s2556_s6 }
 0x5bf   : > { %p2559_p10 = scmp.lt.s32.totalorder %s2557_s12, %s2553_s1 }
 0x5c0   : > { %s2030_s23 = sshll.u32 %s3248_s16, 7 }
 0x5c1   : > { %s3250_s21 = smov %s3249_s15  ;;  %s1614_s22 = scalar_lea.hbm %s3249_s15, %s2030_s23 }
 0x5c2   : > { %p2560_p12 = por %p2559_p10, %p2558_p7 }
 0x5c4   : > { %p2561_p13 = pnand %p2560_p12, %p2554_p8 }
 0x5c6   : > { %2564 = shalt.err (!%p2561_p13)
}
 0x5c7   : > { %s2565_s10 = scalar_lea.hbm %s1614_s22, 128  ;;  %s2567_s20 = scalar_lea.hbm %s3250_s21, 512 }
 0x5c8   : > { %p2566_p0 = scmp.ne.s32.totalorder %s1614_s22, %s2565_s10  ;;  %p2568_p1 = scmp.lt.s32.totalorder %s1614_s22, %s3250_s21 }
 0x5c9   : > { %p2569_p2 = scmp.lt.s32.totalorder %s2567_s20, %s2565_s10 }
 0x5cb   : > { %p2570_p3 = por %p2569_p2, %p2568_p1 }
 0x5cd   : > { %p2571_p5 = pnand %p2570_p3, %p2566_p0 }
 0x5cf   : > { %2574 = shalt.err (!%p2571_p5)
}
 0x5d0   : > { %s2691_s16 = smov 128   ;;  %s2692_s23 = smov 8  }
 0x5d1   : > { %1622 = dma.vmem_to_hbm [thread:$0]  %s1617_s4, 128, %s1614_s22, %s1593_s26, %s2691_s16, %s2691_s16, %s2692_s23  }
 0x5d2 PF: > { %1625 = sbr.rel (!%p2826_p9) target bundleno = 1518 (0x5ee), region = 112 }
 0x5d7   : > { %1631 = vsyncadd %s1598_s11, 128  ;;  %s3252_s29 = sld [smem:[#allocation28_spill]]  ;;  %s1637_s1 = sshll.u32 %s3122_s27, 4  ;;  %s1638_s1 = int_to_ptr.vmem [resolvable:$true] %s1637_s1 }
 0x5d8   : > { %s3253_s12 = sld [smem:[#allocation41_spill]]  ;;  %s2575_s13 = scalar_lea.vmem %s1638_s1, 128 }
 0x5d9   : > { %p2576_p6 = scmp.ne.s32.totalorder %s1638_s1, %s2575_s13  ;;  %s2693_s0 = smov [#allocation17]  }
 0x5da   : > { %s2577_s26 = sshll.u32 %s2693_s0, 4  ;;  %s2578_s26 = int_to_ptr.vmem [resolvable:$false] %s2577_s26 }
 0x5db   : > { %s2579_s4 = scalar_lea.vmem %s2578_s26, 512  ;;  %p2580_p4 = scmp.lt.s32.totalorder %s1638_s1, %s2578_s26 }
 0x5dc   : > { %p2581_p9 = scmp.lt.s32.totalorder %s2579_s4, %s2575_s13 }
 0x5dd   : > { %s2031_s15 = sshll.u32 %s3252_s29, 7 }
 0x5de   : > { %s1635_s10 = scalar_lea.hbm %s3253_s12, %s2031_s15  ;;  %p2582_p8 = por %p2581_p9, %p2580_p4 }
 0x5e0   : > { %p2583_p7 = pnand %p2582_p8, %p2576_p6 }
 0x5e2   : > { %2586 = shalt.err (!%p2583_p7)
}
 0x5e3   : > { %s2587_s22 = scalar_lea.hbm %s1635_s10, 128  ;;  %s2589_s25 = scalar_lea.hbm %s3253_s12, 512 }
 0x5e4   : > { %p2588_p10 = scmp.ne.s32.totalorder %s1635_s10, %s2587_s22  ;;  %p2590_p12 = scmp.lt.s32.totalorder %s1635_s10, %s3253_s12 }
 0x5e5   : > { %p2591_p13 = scmp.lt.s32.totalorder %s2589_s25, %s2587_s22 }
 0x5e7   : > { %p2592_p0 = por %p2591_p13, %p2590_p12 }
 0x5e9   : > { %p2593_p1 = pnand %p2592_p0, %p2588_p10 }
 0x5eb   : > { %2596 = shalt.err (!%p2593_p1)
}
 0x5ec   : > { %s2694_s23 = smov 128   ;;  %s2695_s24 = smov 8  }
 0x5ed   : > { %1643 = dma.vmem_to_hbm [thread:$0]  %s1638_s1, 128, %s1635_s10, %s1598_s11, %s2694_s23, %s2694_s23, %s2695_s24  }
 0x5ee PF: > { %s3254_s29 = sld [smem:[#allocation26_spill]]  ;;  %p2179_p2 = scmp.ge.s32.totalorder %s2671_s18, 2 }
 0x5f0   : > { %p2173_p3 = pnand %p2179_p2, %p2833_p11 }
 0x5f2   : > { %p2174_p5 = pneg %p2173_p3 }
 0x5f4   : > { %s1652_s19 = sand.u32 1, %s3254_s29  }
 0x5f5   : > { %s1653_s6 = scalar_lea.sflag [#allocation4], %s1652_s19 }
 0x5f6   : > { %2642 = dma.done.wait (%p2174_p5), %s1653_s6, 256  }
 0x5f7   : > { %2644 = vsyncadd (%p2174_p5), %s1653_s6, 4294967040  ;;  %s1662_s13 = scalar_lea.sflag [#allocation18], %s1652_s19 }
 0x5f8   : > { %2646 = dma.done.wait (%p2174_p5), %s1662_s13, 256  }
 0x5f9   : > { %2648 = vsyncadd (%p2174_p5), %s1662_s13, 4294967040  ;;  %s46_s18 = sadd.s32 1, %s2671_s18   ;;  %s3256_s14 = sld [smem:[#allocation27_spill]] }
 0x5fa   : > { %p43_p6 = scmp.ge.s32.totalorder %s46_s18, 6   ;;  %s3257_s15 = sld [smem:[#allocation31_spill]] }
 0x5fb   : > { %s3258_s11 = sld [smem:[#allocation29_spill]]  ;;  %s3259_s29 = smov %s2655_s30 }
 0x5fc   : > { %s3261_s16 = smov %s2667_s17 }
 0x5fd   :  { %45 = sbr.rel (!%p43_p6) target bundleno = 26 (0x1a), region = 228 }
 0x5ff   : > { %s3260_s30 = smov %s3256_s14 }
 0x601   : > { %s3262_s17 = smov %s3258_s11 }
 0x602   :  { %1667 = vsyncpa [#allocation3], 1 }
 0x603   :  { %1669 = vsyncpa [#allocation3 + $0x1], 1 }
 0x604   :  { %1670 = vsyncpa [#allocation6], 1 }
 0x605   :  { %1672 = vsyncpa [#allocation6 + $0x1], 1 }
 0x606   :  { %1673 = vsyncpa [#allocation9], 1 }
 0x607   :  { %1675 = vsyncpa [#allocation9 + $0x1], 1 }
 0x608   :  { %1676 = vsyncpa [#allocation12], 1 }
 0x609   :  { %1678 = vsyncpa [#allocation12 + $0x1], 1 }
 0x60a   :  { %1679 = vsyncpa [#allocation15], 1 }
 0x60b   :  { %1681 = vsyncpa [#allocation15 + $0x1], 1 }
 0x60c   :  { %1682 = vsyncpa [#allocation4], 1 }
 0x60d   :  { %1684 = vsyncpa [#allocation4 + $0x1], 1 }
 0x60e   :  { %1685 = vsyncpa [#allocation18], 1 }
 0x60f   :  { %1687 = vsyncpa [#allocation18 + $0x1], 1 }

</bundles_post_ra>
